<compile_context>
chip_gen: v7x
topology: tpu7x:2x2x1
jax: 0.10.0
libtpu: 0.0.40
codegen_flags: <defaults>
</compile_context>

<pallas_src>
import jax
import jax.numpy as jnp
from jax.experimental import pallas as pl
from jax.experimental.pallas import tpu as pltpu


def _round_up(x, m):
    return (x + m - 1) // m * m


# ---------------------------------------------------------------------------
# Kernel 1: parallel tiled GEMM + bias (used for the input projection and the
# vocab projection).  Grid is ("parallel", "parallel") over (M, N) tiles.
# ---------------------------------------------------------------------------
def _matmul_bias_kernel(x_ref, w_ref, b_ref, o_ref):
    o_ref[...] = (jnp.dot(x_ref[...], w_ref[...],
                          preferred_element_type=jnp.float32)
                  + b_ref[...]).astype(o_ref.dtype)


def matmul_bias_pallas(x, w, b, out_dtype=jnp.float32, tm=256, tn=512):
    """x: (M, K), w: (K, N), b: (1, N)  ->  (M, N) in out_dtype.

    M must be a multiple of 8 and K, N multiples of 128 (wrapper guarantees).
    """
    M, K = x.shape
    _, N = w.shape
    tm = min(tm, M)
    tn = min(tn, N)
    Mp = _round_up(M, tm)
    Np = _round_up(N, tn)
    if Mp != M:
        x = jnp.pad(x, ((0, Mp - M), (0, 0)))
    if Np != N:
        w = jnp.pad(w, ((0, 0), (0, Np - N)))
        b = jnp.pad(b, ((0, 0), (0, Np - N)))

    out = pl.pallas_call(
        _matmul_bias_kernel,
        out_shape=jax.ShapeDtypeStruct((Mp, Np), out_dtype),
        grid_spec=pltpu.PrefetchScalarGridSpec(
            num_scalar_prefetch=0,
            grid=(Mp // tm, Np // tn),
            in_specs=[
                pl.BlockSpec((tm, K), lambda i, j: (i, 0)),
                pl.BlockSpec((K, tn), lambda i, j: (0, j)),
                pl.BlockSpec((1, tn), lambda i, j: (0, j)),
            ],
            out_specs=pl.BlockSpec((tm, tn), lambda i, j: (i, j)),
        ),
        compiler_params=pltpu.CompilerParams(
            dimension_semantics=("parallel", "parallel"),
        ),
    )(x, w, b)
    return out[:M, :N]


# ---------------------------------------------------------------------------
# Kernel 2: the serial LSTM recurrence.  Single invocation; fori_loop over T
# inside the body; per step only h @ W_hh^T (the input gates are precomputed).
# ---------------------------------------------------------------------------
def _lstm_recurrence_kernel(gx_ref, whh_ref, h_out_ref, h_sc, c_sc):
    """gx_ref : (T, Bp, 4Hp) f32   precomputed x@W_ih^T + (b_ih+b_hh)
       whh_ref: (Hp, 4Hp)   bf16   W_hh^T (gate-block padded)
       h_out_ref: (T, Bp, Hp) bf16 hidden states for all steps
       h_sc/c_sc: (Bp, Hp) f32 VMEM scratch (recurrent state)."""
    T = gx_ref.shape[0]
    Hp = h_sc.shape[-1]

    # hidden = init_hidden(batch_size): zeros
    h_sc[...] = jnp.zeros_like(h_sc)
    c_sc[...] = jnp.zeros_like(c_sc)

    def step(t, carry):
        h = h_sc[...]
        c = c_sc[...]
        # gates = (x_t @ W_ih^T + b) + h @ W_hh^T      (PyTorch order i,f,g,o)
        gates = gx_ref[t] + jnp.dot(h.astype(whh_ref.dtype), whh_ref[...],
                                    preferred_element_type=jnp.float32)
        i_g = jax.nn.sigmoid(gates[:, 0 * Hp:1 * Hp])
        f_g = jax.nn.sigmoid(gates[:, 1 * Hp:2 * Hp])
        g_g = jnp.tanh(gates[:, 2 * Hp:3 * Hp])
        o_g = jax.nn.sigmoid(gates[:, 3 * Hp:4 * Hp])

        c_new = f_g * c + i_g * g_g
        h_new = o_g * jnp.tanh(c_new)

        c_sc[...] = c_new
        h_sc[...] = h_new
        h_out_ref[t] = h_new.astype(h_out_ref.dtype)
        return carry

    # Short fixed trip counts: unroll for LLO scheduler visibility.
    jax.lax.fori_loop(0, T, step, 0, unroll=(T <= 16))


def lstm_recurrence_pallas(gx, whh_t):
    """gx: (T, Bp, 4Hp) f32, whh_t: (Hp, 4Hp) bf16 -> h_all (T, Bp, Hp) bf16."""
    T, Bp, fourHp = gx.shape
    Hp = fourHp // 4
    return pl.pallas_call(
        _lstm_recurrence_kernel,
        out_shape=jax.ShapeDtypeStruct((T, Bp, Hp), jnp.bfloat16),
        grid_spec=pltpu.PrefetchScalarGridSpec(
            num_scalar_prefetch=0,
            grid=(1,),
            in_specs=[
                pl.BlockSpec((T, Bp, fourHp), lambda i: (0, 0, 0)),
                pl.BlockSpec((Hp, fourHp), lambda i: (0, 0)),
            ],
            out_specs=pl.BlockSpec((T, Bp, Hp), lambda i: (0, 0, 0)),
            scratch_shapes=[
                pltpu.VMEM((Bp, Hp), jnp.float32),   # h state
                pltpu.VMEM((Bp, Hp), jnp.float32),   # c state
            ],
        ),
        compiler_params=pltpu.CompilerParams(
            dimension_semantics=("arbitrary",),      # serial recurrence
        ),
    )(gx, whh_t)


# ---------------------------------------------------------------------------
# Parameter init and one-time weight preparation (pad/transpose/fuse/cast).
# ---------------------------------------------------------------------------
def init_params(key, embed_size, hidden_size, vocab_size):
    ks = jax.random.split(key, 7)
    s = 0.1
    return {
        "embedding": s * jax.random.normal(ks[0], (vocab_size, embed_size), jnp.float32),
        "w_ih": s * jax.random.normal(ks[1], (4 * hidden_size, embed_size), jnp.float32),
        "w_hh": s * jax.random.normal(ks[2], (4 * hidden_size, hidden_size), jnp.float32),
        "b_ih": s * jax.random.normal(ks[3], (4 * hidden_size,), jnp.float32),
        "b_hh": s * jax.random.normal(ks[4], (4 * hidden_size,), jnp.float32),
        "w_out": s * jax.random.normal(ks[5], (vocab_size, hidden_size), jnp.float32),
        "b_out": s * jax.random.normal(ks[6], (vocab_size,), jnp.float32),
    }


def prepare_decoder_weights(params):
    """One-time: pad per-gate to lane-aligned sizes, transpose, fuse biases,
    cast matmul operands to bf16.  Call once, reuse every forward."""
    fourH, E = params["w_ih"].shape
    H = fourH // 4
    V = params["w_out"].shape[0]
    Ep = _round_up(E, 128)
    Hp = _round_up(H, 128)
    Vp = _round_up(V, 128)

    def pad_gate_w(w, in_dim, in_pad):      # (4H, in_dim) -> (4Hp, in_pad)
        w4 = w.reshape(4, H, in_dim)
        w4 = jnp.pad(w4, ((0, 0), (0, Hp - H), (0, in_pad - in_dim)))
        return w4.reshape(4 * Hp, in_pad)

    wih_p = pad_gate_w(params["w_ih"], E, Ep)          # (4Hp, Ep)
    whh_p = pad_gate_w(params["w_hh"], H, Hp)          # (4Hp, Hp)

    b = (params["b_ih"] + params["b_hh"]).reshape(4, H)
    b_p = jnp.pad(b, ((0, 0), (0, Hp - H))).reshape(1, 4 * Hp)

    wout_p = jnp.pad(params["w_out"], ((0, Vp - V), (0, Hp - H)))   # (Vp, Hp)
    bout_p = jnp.pad(params["b_out"], (0, Vp - V)).reshape(1, Vp)

    return {
        "embedding": params["embedding"],                       # f32 (V, E)
        "wih_t": wih_p.T.astype(jnp.bfloat16),                  # (Ep, 4Hp)
        "whh_t": whh_p.T.astype(jnp.bfloat16),                  # (Hp, 4Hp)
        "b": b_p.astype(jnp.float32),                           # (1, 4Hp)
        "wout_t": wout_p.T.astype(jnp.bfloat16),                # (Hp, Vp)
        "bout": bout_p.astype(jnp.float32),                     # (1, Vp)
    }


# ---------------------------------------------------------------------------
# Forward pass (DecoderRNN.forward semantics).
# ---------------------------------------------------------------------------
def decoder_forward(features, captions, prep):
    """features: (B, E) f32, captions: (B, L) int32 -> logits (B, L, V) f32."""
    emb = prep["embedding"]
    V, E = emb.shape
    Ep, fourHp = prep["wih_t"].shape
    Hp = fourHp // 4
    B = features.shape[0]

    # Glue (stays in XLA): embedding gather + concat of image features.
    caps = captions[:, :-1]                                     # (B, L-1)
    embeds = emb[caps]                                          # (B, L-1, E)
    x = jnp.concatenate([features[:, None, :], embeds], axis=1)  # (B, T, E)
    T = x.shape[1]

    # Pad B -> multiple of 8, E -> Ep; cast to bf16; go time-major.
    Bp = _round_up(B, 8)
    x = jnp.pad(x, ((0, Bp - B), (0, 0), (0, Ep - E))).astype(jnp.bfloat16)
    x_tm = jnp.transpose(x, (1, 0, 2))                          # (T, Bp, Ep)

    # 1) Input projection: one big parallel GEMM over all timesteps.
    gx = matmul_bias_pallas(x_tm.reshape(T * Bp, Ep), prep["wih_t"], prep["b"],
                            out_dtype=jnp.float32)              # (T*Bp, 4Hp)
    gx = gx.reshape(T, Bp, fourHp)

    # 2) Serial LSTM recurrence (one kernel, fori_loop over T inside).
    h_all = lstm_recurrence_pallas(gx, prep["whh_t"])           # (T, Bp, Hp) bf16

    # 3) Vocab projection: parallel GEMM over (T*Bp, Hp) x (Hp, Vp).
    logits = matmul_bias_pallas(h_all.reshape(T * Bp, Hp), prep["wout_t"],
                                prep["bout"], out_dtype=jnp.float32)
    logits = logits.reshape(T, Bp, -1)
    logits = jnp.transpose(logits, (1, 0, 2))[:B, :, :V]        # (B, T, V)
    return logits


# ---------------------------------------------------------------------------
# Pure-JAX reference (f32 lax.scan LSTM) for correctness checking.
# ---------------------------------------------------------------------------
def decoder_forward_ref(features, captions, params):
    caps = captions[:, :-1]
    embeds = params["embedding"][caps]
    x = jnp.concatenate([features[:, None, :], embeds], 1)      # (B, T, E)
    B = x.shape[0]
    H = params["w_hh"].shape[1]
    b = params["b_ih"] + params["b_hh"]

    def step(carry, x_t):
        h, c = carry
        gates = x_t @ params["w_ih"].T + h @ params["w_hh"].T + b
        i_g, f_g, g_g, o_g = jnp.split(gates, 4, axis=-1)
        i_g = jax.nn.sigmoid(i_g); f_g = jax.nn.sigmoid(f_g)
        g_g = jnp.tanh(g_g);       o_g = jax.nn.sigmoid(o_g)
        c = f_g * c + i_g * g_g
        h = o_g * jnp.tanh(c)
        return (h, c), h

    h0 = jnp.zeros((B, H), jnp.float32)
    c0 = jnp.zeros((B, H), jnp.float32)
    _, hs = jax.lax.scan(step, (h0, c0), jnp.transpose(x, (1, 0, 2)))
    hs = jnp.transpose(hs, (1, 0, 2))                           # (B, T, H)
    return hs @ params["w_out"].T + params["b_out"]


if __name__ == "__main__":
    embed_size, hidden_size, vocab_size = 32, 32, 64
    batch_size, caption_len = 2, 8

    key = jax.random.PRNGKey(0)
    k_par, k_feat, k_cap = jax.random.split(key, 3)
    params = init_params(k_par, embed_size, hidden_size, vocab_size)
    prep = prepare_decoder_weights(params)    # one-time weight transform

    features = jax.random.normal(k_feat, (batch_size, embed_size), jnp.float32)
    captions = jax.random.randint(k_cap, (batch_size, caption_len), 0, vocab_size,
                                  dtype=jnp.int32)

    fwd = jax.jit(decoder_forward)
    out = jax.block_until_ready(fwd(features, captions, prep))

    ref = decoder_forward_ref(features, captions, params)
    assert out.shape == (batch_size, caption_len, vocab_size)
    # bf16 matmul operands (f32 accumulate) -> loosened tolerance vs f32 ref.
    max_err = float(jnp.max(jnp.abs(out - ref)))
    assert jnp.allclose(out, ref, atol=2e-2, rtol=2e-2), \
        f"mismatch vs JAX reference, max abs err = {max_err}"

    print("KERNEL_OK")
</pallas_src>

<mosaic_0001>
module attributes {stable_mosaic.version = 11 : i64} {
  func.func @_matmul_bias_kernel(%arg0: i32, %arg1: i32, %arg2: memref<64x128xbf16, #tpu.memory_space<vmem>>, %arg3: memref<128x512xbf16, #tpu.memory_space<vmem>>, %arg4: memref<1x512xf32, #tpu.memory_space<vmem>>, %arg5: memref<64x512xf32, #tpu.memory_space<vmem>>) attributes {dimension_semantics = [#tpu.dimension_semantics<parallel>, #tpu.dimension_semantics<parallel>], iteration_bounds = array<i64: 1, 1>, scalar_prefetch = 0 : i64, scratch_operands = 0 : i64, tpu.core_type = #tpu.core_type<tc>, window_params = [{transform_indices = @transform_0, window_bounds = array<i64: 64, 128>}, {transform_indices = @transform_1, window_bounds = array<i64: 128, 512>}, {transform_indices = @transform_2, window_bounds = array<i64: 1, 512>}, {transform_indices = @transform_3, window_bounds = array<i64: 64, 512>}]} {
    %c0 = arith.constant 0 : index
    %c0_0 = arith.constant 0 : index
    %0 = vector.load %arg2[%c0, %c0_0] : memref<64x128xbf16, #tpu.memory_space<vmem>>, vector<64x128xbf16>
    %c0_1 = arith.constant 0 : index
    %c0_2 = arith.constant 0 : index
    %1 = vector.load %arg3[%c0_1, %c0_2] : memref<128x512xbf16, #tpu.memory_space<vmem>>, vector<128x512xbf16>
    %cst = arith.constant dense<0.000000e+00> : vector<64x512xf32>
    %2 = tpu.matmul %0, %1, %cst {dimension_numbers = #tpu.dot_dimension_numbers<[1], [0], [0], [1], [0, 0, 1, 1], [], []>} : vector<64x128xbf16>, vector<128x512xbf16>, vector<64x512xf32> -> vector<64x512xf32>
    %c0_3 = arith.constant 0 : index
    %c0_4 = arith.constant 0 : index
    %3 = vector.load %arg4[%c0_3, %c0_4] : memref<1x512xf32, #tpu.memory_space<vmem>>, vector<1x512xf32>
    %4 = vector.broadcast %3 : vector<1x512xf32> to vector<64x512xf32>
    %5 = arith.addf %2, %4 : vector<64x512xf32>
    %c0_5 = arith.constant 0 : index
    %c0_6 = arith.constant 0 : index
    %6 = vector.load %arg5[%c0_5, %c0_6] : memref<64x512xf32, #tpu.memory_space<vmem>>, vector<64x512xf32>
    tpu.vector_store %arg5[%c0_5, %c0_6], %5 {strides = array<i32>} : memref<64x512xf32, #tpu.memory_space<vmem>>, vector<64x512xf32>,
    return
  }
  func.func @transform_0(%arg0: i32, %arg1: i32) -> (i32, i32) {
    %c0_i32 = arith.constant 0 : i32
    %c0_i32_0 = arith.constant 0 : i32
    return %arg0, %c0_i32 : i32, i32
  }
  func.func @transform_1(%arg0: i32, %arg1: i32) -> (i32, i32) {
    %c0_i32 = arith.constant 0 : i32
    %c0_i32_0 = arith.constant 0 : i32
    return %c0_i32, %arg1 : i32, i32
  }
  func.func @transform_2(%arg0: i32, %arg1: i32) -> (i32, i32) {
    %c0_i32 = arith.constant 0 : i32
    %c0_i32_0 = arith.constant 0 : i32
    return %c0_i32, %arg1 : i32, i32
  }
  func.func @transform_3(%arg0: i32, %arg1: i32) -> (i32, i32) {
    %c0_i32 = arith.constant 0 : i32
    return %arg0, %arg1 : i32, i32
  }
}

module attributes {stable_mosaic.version = 11 : i64} {
  func.func @_matmul_bias_kernel(%arg0: i32, %arg1: i32, %arg2: memref<64x128xbf16, #tpu.memory_space<vmem>>, %arg3: memref<128x128xbf16, #tpu.memory_space<vmem>>, %arg4: memref<1x128xf32, #tpu.memory_space<vmem>>, %arg5: memref<64x128xf32, #tpu.memory_space<vmem>>) attributes {dimension_semantics = [#tpu.dimension_semantics<parallel>, #tpu.dimension_semantics<parallel>], iteration_bounds = array<i64: 1, 1>, scalar_prefetch = 0 : i64, scratch_operands = 0 : i64, tpu.core_type = #tpu.core_type<tc>, window_params = [{transform_indices = @transform_0, window_bounds = array<i64: 64, 128>}, {transform_indices = @transform_1, window_bounds = array<i64: 128, 128>}, {transform_indices = @transform_2, window_bounds = array<i64: 1, 128>}, {transform_indices = @transform_3, window_bounds = array<i64: 64, 128>}]} {
    %c0 = arith.constant 0 : index
    %c0_0 = arith.constant 0 : index
    %0 = vector.load %arg2[%c0, %c0_0] : memref<64x128xbf16, #tpu.memory_space<vmem>>, vector<64x128xbf16>
    %c0_1 = arith.constant 0 : index
    %c0_2 = arith.constant 0 : index
    %1 = vector.load %arg3[%c0_1, %c0_2] : memref<128x128xbf16, #tpu.memory_space<vmem>>, vector<128x128xbf16>
    %cst = arith.constant dense<0.000000e+00> : vector<64x128xf32>
    %2 = tpu.matmul %0, %1, %cst {dimension_numbers = #tpu.dot_dimension_numbers<[1], [0], [0], [1], [0, 0, 1, 1], [], []>} : vector<64x128xbf16>, vector<128x128xbf16>, vector<64x128xf32> -> vector<64x128xf32>
    %c0_3 = arith.constant 0 : index
    %c0_4 = arith.constant 0 : index
    %3 = vector.load %arg4[%c0_3, %c0_4] : memref<1x128xf32, #tpu.memory_space<vmem>>, vector<1x128xf32>
    %4 = vector.broadcast %3 : vector<1x128xf32> to vector<64x128xf32>
    %5 = arith.addf %2, %4 : vector<64x128xf32>
    %c0_5 = arith.constant 0 : index
    %c0_6 = arith.constant 0 : index
    %6 = vector.load %arg5[%c0_5, %c0_6] : memref<64x128xf32, #tpu.memory_space<vmem>>, vector<64x128xf32>
    tpu.vector_store %arg5[%c0_5, %c0_6], %5 {strides = array<i32>} : memref<64x128xf32, #tpu.memory_space<vmem>>, vector<64x128xf32>,
    return
  }
  func.func @transform_0(%arg0: i32, %arg1: i32) -> (i32, i32) {
    %c0_i32 = arith.constant 0 : i32
    %c0_i32_0 = arith.constant 0 : i32
    return %arg0, %c0_i32 : i32, i32
  }
  func.func @transform_1(%arg0: i32, %arg1: i32) -> (i32, i32) {
    %c0_i32 = arith.constant 0 : i32
    %c0_i32_0 = arith.constant 0 : i32
    return %c0_i32, %arg1 : i32, i32
  }
  func.func @transform_2(%arg0: i32, %arg1: i32) -> (i32, i32) {
    %c0_i32 = arith.constant 0 : i32
    %c0_i32_0 = arith.constant 0 : i32
    return %c0_i32, %arg1 : i32, i32
  }
  func.func @transform_3(%arg0: i32, %arg1: i32) -> (i32, i32) {
    %c0_i32 = arith.constant 0 : i32
    return %arg0, %arg1 : i32, i32
  }
}

module attributes {stable_mosaic.version = 11 : i64} {
  func.func @_lstm_recurrence_kernel(%arg0: i32, %arg1: memref<8x8x512xf32, #tpu.memory_space<vmem>>, %arg2: memref<128x512xbf16, #tpu.memory_space<vmem>>, %arg3: memref<8x8x128xbf16, #tpu.memory_space<vmem>>, %arg4: memref<8x128xf32, #tpu.memory_space<vmem>>, %arg5: memref<8x128xf32, #tpu.memory_space<vmem>>) attributes {dimension_semantics = [#tpu.dimension_semantics<arbitrary>], iteration_bounds = array<i64: 1>, scalar_prefetch = 0 : i64, scratch_operands = 2 : i64, tpu.core_type = #tpu.core_type<tc>, window_params = [{pipeline_mode = #tpu.pipeline_mode<synchronous>, transform_indices = @transform_0, window_bounds = array<i64: 8, 8, 512>}, {pipeline_mode = #tpu.pipeline_mode<synchronous>, transform_indices = @transform_1, window_bounds = array<i64: 128, 512>}, {pipeline_mode = #tpu.pipeline_mode<synchronous>, transform_indices = @transform_2, window_bounds = array<i64: 8, 8, 128>}]} {
    %cst = arith.constant 0.000000e+00 : f32
    %0 = vector.broadcast %cst : f32 to vector<8x128xf32>
    %c0 = arith.constant 0 : index
    %c0_0 = arith.constant 0 : index
    %1 = vector.load %arg4[%c0, %c0_0] : memref<8x128xf32, #tpu.memory_space<vmem>>, vector<8x128xf32>
    tpu.vector_store %arg4[%c0, %c0_0], %0 {strides = array<i32>} : memref<8x128xf32, #tpu.memory_space<vmem>>, vector<8x128xf32>,
    %cst_1 = arith.constant 0.000000e+00 : f32
    %2 = vector.broadcast %cst_1 : f32 to vector<8x128xf32>
    %c0_2 = arith.constant 0 : index
    %c0_3 = arith.constant 0 : index
    %3 = vector.load %arg5[%c0_2, %c0_3] : memref<8x128xf32, #tpu.memory_space<vmem>>, vector<8x128xf32>
    tpu.vector_store %arg5[%c0_2, %c0_3], %2 {strides = array<i32>} : memref<8x128xf32, #tpu.memory_space<vmem>>, vector<8x128xf32>,
    %c0_i32 = arith.constant 0 : i32
    %c0_4 = arith.constant 0 : index
    %c0_5 = arith.constant 0 : index
    %4 = vector.load %arg4[%c0_4, %c0_5] : memref<8x128xf32, #tpu.memory_space<vmem>>, vector<8x128xf32>
    %c0_6 = arith.constant 0 : index
    %c0_7 = arith.constant 0 : index
    %5 = vector.load %arg5[%c0_6, %c0_7] : memref<8x128xf32, #tpu.memory_space<vmem>>, vector<8x128xf32>
    %6 = arith.index_cast %c0_i32 : i32 to index
    %c0_8 = arith.constant 0 : index
    %c0_9 = arith.constant 0 : index
    %7 = vector.load %arg1[%6, %c0_8, %c0_9] : memref<8x8x512xf32, #tpu.memory_space<vmem>>, vector<1x8x512xf32>
    %8 = vector.shape_cast %7 : vector<1x8x512xf32> to vector<8x512xf32>
    %9 = arith.truncf %4 : vector<8x128xf32> to vector<8x128xbf16>
    %c0_10 = arith.constant 0 : index
    %c0_11 = arith.constant 0 : index
    %10 = vector.load %arg2[%c0_10, %c0_11] : memref<128x512xbf16, #tpu.memory_space<vmem>>, vector<128x512xbf16>
    %cst_12 = arith.constant dense<0.000000e+00> : vector<8x512xf32>
    %11 = tpu.matmul %9, %10, %cst_12 {dimension_numbers = #tpu.dot_dimension_numbers<[1], [0], [0], [1], [0, 0, 1, 1], [], []>} : vector<8x128xbf16>, vector<128x512xbf16>, vector<8x512xf32> -> vector<8x512xf32>
    %12 = arith.addf %8, %11 : vector<8x512xf32>
    %13 = vector.extract_strided_slice %12 {offsets = [0, 0], sizes = [8, 128], strides = [1, 1]} : vector<8x512xf32> to vector<8x128xf32>
    %14 = arith.negf %13 : vector<8x128xf32>
    %15 = math.exp %14 : vector<8x128xf32>
    %cst_13 = arith.constant 1.000000e+00 : f32
    %16 = vector.broadcast %cst_13 : f32 to vector<8x128xf32>
    %17 = arith.addf %16, %15 : vector<8x128xf32>
    %18 = arith.divf %16, %17 : vector<8x128xf32>
    %19 = vector.extract_strided_slice %12 {offsets = [0, 128], sizes = [8, 128], strides = [1, 1]} : vector<8x512xf32> to vector<8x128xf32>
    %20 = arith.negf %19 : vector<8x128xf32>
    %21 = math.exp %20 : vector<8x128xf32>
    %cst_14 = arith.constant 1.000000e+00 : f32
    %22 = vector.broadcast %cst_14 : f32 to vector<8x128xf32>
    %23 = arith.addf %22, %21 : vector<8x128xf32>
    %24 = arith.divf %22, %23 : vector<8x128xf32>
    %25 = vector.extract_strided_slice %12 {offsets = [0, 256], sizes = [8, 128], strides = [1, 1]} : vector<8x512xf32> to vector<8x128xf32>
    %26 = math.tanh %25 : vector<8x128xf32>
    %27 = vector.extract_strided_slice %12 {offsets = [0, 384], sizes = [8, 128], strides = [1, 1]} : vector<8x512xf32> to vector<8x128xf32>
    %28 = arith.negf %27 : vector<8x128xf32>
    %29 = math.exp %28 : vector<8x128xf32>
    %cst_15 = arith.constant 1.000000e+00 : f32
    %30 = vector.broadcast %cst_15 : f32 to vector<8x128xf32>
    %31 = arith.addf %30, %29 : vector<8x128xf32>
    %32 = arith.divf %30, %31 : vector<8x128xf32>
    %33 = arith.mulf %24, %5 : vector<8x128xf32>
    %34 = arith.mulf %18, %26 : vector<8x128xf32>
    %35 = arith.addf %33, %34 : vector<8x128xf32>
    %36 = math.tanh %35 : vector<8x128xf32>
    %37 = arith.mulf %32, %36 : vector<8x128xf32>
    %c0_16 = arith.constant 0 : index
    %c0_17 = arith.constant 0 : index
    %38 = vector.load %arg5[%c0_16, %c0_17] : memref<8x128xf32, #tpu.memory_space<vmem>>, vector<8x128xf32>
    tpu.vector_store %arg5[%c0_16, %c0_17], %35 {strides = array<i32>} : memref<8x128xf32, #tpu.memory_space<vmem>>, vector<8x128xf32>,
    %c0_18 = arith.constant 0 : index
    %c0_19 = arith.constant 0 : index
    %39 = vector.load %arg4[%c0_18, %c0_19] : memref<8x128xf32, #tpu.memory_space<vmem>>, vector<8x128xf32>
    tpu.vector_store %arg4[%c0_18, %c0_19], %37 {strides = array<i32>} : memref<8x128xf32, #tpu.memory_space<vmem>>, vector<8x128xf32>,
    %40 = arith.truncf %37 : vector<8x128xf32> to vector<8x128xbf16>
    %41 = arith.index_cast %c0_i32 : i32 to index
    %c0_20 = arith.constant 0 : index
    %c0_21 = arith.constant 0 : index
    %42 = vector.load %arg3[%41, %c0_20, %c0_21] : memref<8x8x128xbf16, #tpu.memory_space<vmem>>, vector<1x8x128xbf16>
    %43 = vector.shape_cast %42 : vector<1x8x128xbf16> to vector<8x128xbf16>
    %44 = vector.shape_cast %40 : vector<8x128xbf16> to vector<1x8x128xbf16>
    tpu.vector_store %arg3[%41, %c0_20, %c0_21], %44 {strides = array<i32>} : memref<8x8x128xbf16, #tpu.memory_space<vmem>>, vector<1x8x128xbf16>,
    %c1_i32 = arith.constant 1 : i32
    %c0_22 = arith.constant 0 : index
    %c0_23 = arith.constant 0 : index
    %45 = vector.load %arg4[%c0_22, %c0_23] : memref<8x128xf32, #tpu.memory_space<vmem>>, vector<8x128xf32>
    %c0_24 = arith.constant 0 : index
    %c0_25 = arith.constant 0 : index
    %46 = vector.load %arg5[%c0_24, %c0_25] : memref<8x128xf32, #tpu.memory_space<vmem>>, vector<8x128xf32>
    %47 = arith.index_cast %c1_i32 : i32 to index
    %c0_26 = arith.constant 0 : index
    %c0_27 = arith.constant 0 : index
    %48 = vector.load %arg1[%47, %c0_26, %c0_27] : memref<8x8x512xf32, #tpu.memory_space<vmem>>, vector<1x8x512xf32>
    %49 = vector.shape_cast %48 : vector<1x8x512xf32> to vector<8x512xf32>
    %50 = arith.truncf %45 : vector<8x128xf32> to vector<8x128xbf16>
    %c0_28 = arith.constant 0 : index
    %c0_29 = arith.constant 0 : index
    %51 = vector.load %arg2[%c0_28, %c0_29] : memref<128x512xbf16, #tpu.memory_space<vmem>>, vector<128x512xbf16>
    %cst_30 = arith.constant dense<0.000000e+00> : vector<8x512xf32>
    %52 = tpu.matmul %50, %51, %cst_30 {dimension_numbers = #tpu.dot_dimension_numbers<[1], [0], [0], [1], [0, 0, 1, 1], [], []>} : vector<8x128xbf16>, vector<128x512xbf16>, vector<8x512xf32> -> vector<8x512xf32>
    %53 = arith.addf %49, %52 : vector<8x512xf32>
    %54 = vector.extract_strided_slice %53 {offsets = [0, 0], sizes = [8, 128], strides = [1, 1]} : vector<8x512xf32> to vector<8x128xf32>
    %55 = arith.negf %54 : vector<8x128xf32>
    %56 = math.exp %55 : vector<8x128xf32>
    %cst_31 = arith.constant 1.000000e+00 : f32
    %57 = vector.broadcast %cst_31 : f32 to vector<8x128xf32>
    %58 = arith.addf %57, %56 : vector<8x128xf32>
    %59 = arith.divf %57, %58 : vector<8x128xf32>
    %60 = vector.extract_strided_slice %53 {offsets = [0, 128], sizes = [8, 128], strides = [1, 1]} : vector<8x512xf32> to vector<8x128xf32>
    %61 = arith.negf %60 : vector<8x128xf32>
    %62 = math.exp %61 : vector<8x128xf32>
    %cst_32 = arith.constant 1.000000e+00 : f32
    %63 = vector.broadcast %cst_32 : f32 to vector<8x128xf32>
    %64 = arith.addf %63, %62 : vector<8x128xf32>
    %65 = arith.divf %63, %64 : vector<8x128xf32>
    %66 = vector.extract_strided_slice %53 {offsets = [0, 256], sizes = [8, 128], strides = [1, 1]} : vector<8x512xf32> to vector<8x128xf32>
    %67 = math.tanh %66 : vector<8x128xf32>
    %68 = vector.extract_strided_slice %53 {offsets = [0, 384], sizes = [8, 128], strides = [1, 1]} : vector<8x512xf32> to vector<8x128xf32>
    %69 = arith.negf %68 : vector<8x128xf32>
    %70 = math.exp %69 : vector<8x128xf32>
    %cst_33 = arith.constant 1.000000e+00 : f32
    %71 = vector.broadcast %cst_33 : f32 to vector<8x128xf32>
    %72 = arith.addf %71, %70 : vector<8x128xf32>
    %73 = arith.divf %71, %72 : vector<8x128xf32>
    %74 = arith.mulf %65, %46 : vector<8x128xf32>
    %75 = arith.mulf %59, %67 : vector<8x128xf32>
    %76 = arith.addf %74, %75 : vector<8x128xf32>
    %77 = math.tanh %76 : vector<8x128xf32>
    %78 = arith.mulf %73, %77 : vector<8x128xf32>
    %c0_34 = arith.constant 0 : index
    %c0_35 = arith.constant 0 : index
    %79 = vector.load %arg5[%c0_34, %c0_35] : memref<8x128xf32, #tpu.memory_space<vmem>>, vector<8x128xf32>
    tpu.vector_store %arg5[%c0_34, %c0_35], %76 {strides = array<i32>} : memref<8x128xf32, #tpu.memory_space<vmem>>, vector<8x128xf32>,
    %c0_36 = arith.constant 0 : index
    %c0_37 = arith.constant 0 : index
    %80 = vector.load %arg4[%c0_36, %c0_37] : memref<8x128xf32, #tpu.memory_space<vmem>>, vector<8x128xf32>
    tpu.vector_store %arg4[%c0_36, %c0_37], %78 {strides = array<i32>} : memref<8x128xf32, #tpu.memory_space<vmem>>, vector<8x128xf32>,
    %81 = arith.truncf %78 : vector<8x128xf32> to vector<8x128xbf16>
    %82 = arith.index_cast %c1_i32 : i32 to index
    %c0_38 = arith.constant 0 : index
    %c0_39 = arith.constant 0 : index
    %83 = vector.load %arg3[%82, %c0_38, %c0_39] : memref<8x8x128xbf16, #tpu.memory_space<vmem>>, vector<1x8x128xbf16>
    %84 = vector.shape_cast %83 : vector<1x8x128xbf16> to vector<8x128xbf16>
    %85 = vector.shape_cast %81 : vector<8x128xbf16> to vector<1x8x128xbf16>
    tpu.vector_store %arg3[%82, %c0_38, %c0_39], %85 {strides = array<i32>} : memref<8x8x128xbf16, #tpu.memory_space<vmem>>, vector<1x8x128xbf16>,
    %c2_i32 = arith.constant 2 : i32
    %c0_40 = arith.constant 0 : index
    %c0_41 = arith.constant 0 : index
    %86 = vector.load %arg4[%c0_40, %c0_41] : memref<8x128xf32, #tpu.memory_space<vmem>>, vector<8x128xf32>
    %c0_42 = arith.constant 0 : index
    %c0_43 = arith.constant 0 : index
    %87 = vector.load %arg5[%c0_42, %c0_43] : memref<8x128xf32, #tpu.memory_space<vmem>>, vector<8x128xf32>
    %88 = arith.index_cast %c2_i32 : i32 to index
    %c0_44 = arith.constant 0 : index
    %c0_45 = arith.constant 0 : index
    %89 = vector.load %arg1[%88, %c0_44, %c0_45] : memref<8x8x512xf32, #tpu.memory_space<vmem>>, vector<1x8x512xf32>
    %90 = vector.shape_cast %89 : vector<1x8x512xf32> to vector<8x512xf32>
    %91 = arith.truncf %86 : vector<8x128xf32> to vector<8x128xbf16>
    %c0_46 = arith.constant 0 : index
    %c0_47 = arith.constant 0 : index
    %92 = vector.load %arg2[%c0_46, %c0_47] : memref<128x512xbf16, #tpu.memory_space<vmem>>, vector<128x512xbf16>
    %cst_48 = arith.constant dense<0.000000e+00> : vector<8x512xf32>
    %93 = tpu.matmul %91, %92, %cst_48 {dimension_numbers = #tpu.dot_dimension_numbers<[1], [0], [0], [1], [0, 0, 1, 1], [], []>} : vector<8x128xbf16>, vector<128x512xbf16>, vector<8x512xf32> -> vector<8x512xf32>
    %94 = arith.addf %90, %93 : vector<8x512xf32>
    %95 = vector.extract_strided_slice %94 {offsets = [0, 0], sizes = [8, 128], strides = [1, 1]} : vector<8x512xf32> to vector<8x128xf32>
    %96 = arith.negf %95 : vector<8x128xf32>
    %97 = math.exp %96 : vector<8x128xf32>
    %cst_49 = arith.constant 1.000000e+00 : f32
    %98 = vector.broadcast %cst_49 : f32 to vector<8x128xf32>
    %99 = arith.addf %98, %97 : vector<8x128xf32>
    %100 = arith.divf %98, %99 : vector<8x128xf32>
    %101 = vector.extract_strided_slice %94 {offsets = [0, 128], sizes = [8, 128], strides = [1, 1]} : vector<8x512xf32> to vector<8x128xf32>
    %102 = arith.negf %101 : vector<8x128xf32>
    %103 = math.exp %102 : vector<8x128xf32>
    %cst_50 = arith.constant 1.000000e+00 : f32
    %104 = vector.broadcast %cst_50 : f32 to vector<8x128xf32>
    %105 = arith.addf %104, %103 : vector<8x128xf32>
    %106 = arith.divf %104, %105 : vector<8x128xf32>
    %107 = vector.extract_strided_slice %94 {offsets = [0, 256], sizes = [8, 128], strides = [1, 1]} : vector<8x512xf32> to vector<8x128xf32>
    %108 = math.tanh %107 : vector<8x128xf32>
    %109 = vector.extract_strided_slice %94 {offsets = [0, 384], sizes = [8, 128], strides = [1, 1]} : vector<8x512xf32> to vector<8x128xf32>
    %110 = arith.negf %109 : vector<8x128xf32>
    %111 = math.exp %110 : vector<8x128xf32>
    %cst_51 = arith.constant 1.000000e+00 : f32
    %112 = vector.broadcast %cst_51 : f32 to vector<8x128xf32>
    %113 = arith.addf %112, %111 : vector<8x128xf32>
    %114 = arith.divf %112, %113 : vector<8x128xf32>
    %115 = arith.mulf %106, %87 : vector<8x128xf32>
    %116 = arith.mulf %100, %108 : vector<8x128xf32>
    %117 = arith.addf %115, %116 : vector<8x128xf32>
    %118 = math.tanh %117 : vector<8x128xf32>
    %119 = arith.mulf %114, %118 : vector<8x128xf32>
    %c0_52 = arith.constant 0 : index
    %c0_53 = arith.constant 0 : index
    %120 = vector.load %arg5[%c0_52, %c0_53] : memref<8x128xf32, #tpu.memory_space<vmem>>, vector<8x128xf32>
    tpu.vector_store %arg5[%c0_52, %c0_53], %117 {strides = array<i32>} : memref<8x128xf32, #tpu.memory_space<vmem>>, vector<8x128xf32>,
    %c0_54 = arith.constant 0 : index
    %c0_55 = arith.constant 0 : index
    %121 = vector.load %arg4[%c0_54, %c0_55] : memref<8x128xf32, #tpu.memory_space<vmem>>, vector<8x128xf32>
    tpu.vector_store %arg4[%c0_54, %c0_55], %119 {strides = array<i32>} : memref<8x128xf32, #tpu.memory_space<vmem>>, vector<8x128xf32>,
    %122 = arith.truncf %119 : vector<8x128xf32> to vector<8x128xbf16>
    %123 = arith.index_cast %c2_i32 : i32 to index
    %c0_56 = arith.constant 0 : index
    %c0_57 = arith.constant 0 : index
    %124 = vector.load %arg3[%123, %c0_56, %c0_57] : memref<8x8x128xbf16, #tpu.memory_space<vmem>>, vector<1x8x128xbf16>
    %125 = vector.shape_cast %124 : vector<1x8x128xbf16> to vector<8x128xbf16>
    %126 = vector.shape_cast %122 : vector<8x128xbf16> to vector<1x8x128xbf16>
    tpu.vector_store %arg3[%123, %c0_56, %c0_57], %126 {strides = array<i32>} : memref<8x8x128xbf16, #tpu.memory_space<vmem>>, vector<1x8x128xbf16>,
    %c3_i32 = arith.constant 3 : i32
    %c0_58 = arith.constant 0 : index
    %c0_59 = arith.constant 0 : index
    %127 = vector.load %arg4[%c0_58, %c0_59] : memref<8x128xf32, #tpu.memory_space<vmem>>, vector<8x128xf32>
    %c0_60 = arith.constant 0 : index
    %c0_61 = arith.constant 0 : index
    %128 = vector.load %arg5[%c0_60, %c0_61] : memref<8x128xf32, #tpu.memory_space<vmem>>, vector<8x128xf32>
    %129 = arith.index_cast %c3_i32 : i32 to index
    %c0_62 = arith.constant 0 : index
    %c0_63 = arith.constant 0 : index
    %130 = vector.load %arg1[%129, %c0_62, %c0_63] : memref<8x8x512xf32, #tpu.memory_space<vmem>>, vector<1x8x512xf32>
    %131 = vector.shape_cast %130 : vector<1x8x512xf32> to vector<8x512xf32>
    %132 = arith.truncf %127 : vector<8x128xf32> to vector<8x128xbf16>
    %c0_64 = arith.constant 0 : index
    %c0_65 = arith.constant 0 : index
    %133 = vector.load %arg2[%c0_64, %c0_65] : memref<128x512xbf16, #tpu.memory_space<vmem>>, vector<128x512xbf16>
    %cst_66 = arith.constant dense<0.000000e+00> : vector<8x512xf32>
    %134 = tpu.matmul %132, %133, %cst_66 {dimension_numbers = #tpu.dot_dimension_numbers<[1], [0], [0], [1], [0, 0, 1, 1], [], []>} : vector<8x128xbf16>, vector<128x512xbf16>, vector<8x512xf32> -> vector<8x512xf32>
    %135 = arith.addf %131, %134 : vector<8x512xf32>
    %136 = vector.extract_strided_slice %135 {offsets = [0, 0], sizes = [8, 128], strides = [1, 1]} : vector<8x512xf32> to vector<8x128xf32>
    %137 = arith.negf %136 : vector<8x128xf32>
    %138 = math.exp %137 : vector<8x128xf32>
    %cst_67 = arith.constant 1.000000e+00 : f32
    %139 = vector.broadcast %cst_67 : f32 to vector<8x128xf32>
    %140 = arith.addf %139, %138 : vector<8x128xf32>
    %141 = arith.divf %139, %140 : vector<8x128xf32>
    %142 = vector.extract_strided_slice %135 {offsets = [0, 128], sizes = [8, 128], strides = [1, 1]} : vector<8x512xf32> to vector<8x128xf32>
    %143 = arith.negf %142 : vector<8x128xf32>
    %144 = math.exp %143 : vector<8x128xf32>
    %cst_68 = arith.constant 1.000000e+00 : f32
    %145 = vector.broadcast %cst_68 : f32 to vector<8x128xf32>
    %146 = arith.addf %145, %144 : vector<8x128xf32>
    %147 = arith.divf %145, %146 : vector<8x128xf32>
    %148 = vector.extract_strided_slice %135 {offsets = [0, 256], sizes = [8, 128], strides = [1, 1]} : vector<8x512xf32> to vector<8x128xf32>
    %149 = math.tanh %148 : vector<8x128xf32>
    %150 = vector.extract_strided_slice %135 {offsets = [0, 384], sizes = [8, 128], strides = [1, 1]} : vector<8x512xf32> to vector<8x128xf32>
    %151 = arith.negf %150 : vector<8x128xf32>
    %152 = math.exp %151 : vector<8x128xf32>
    %cst_69 = arith.constant 1.000000e+00 : f32
    %153 = vector.broadcast %cst_69 : f32 to vector<8x128xf32>
    %154 = arith.addf %153, %152 : vector<8x128xf32>
    %155 = arith.divf %153, %154 : vector<8x128xf32>
    %156 = arith.mulf %147, %128 : vector<8x128xf32>
    %157 = arith.mulf %141, %149 : vector<8x128xf32>
    %158 = arith.addf %156, %157 : vector<8x128xf32>
    %159 = math.tanh %158 : vector<8x128xf32>
    %160 = arith.mulf %155, %159 : vector<8x128xf32>
    %c0_70 = arith.constant 0 : index
    %c0_71 = arith.constant 0 : index
    %161 = vector.load %arg5[%c0_70, %c0_71] : memref<8x128xf32, #tpu.memory_space<vmem>>, vector<8x128xf32>
    tpu.vector_store %arg5[%c0_70, %c0_71], %158 {strides = array<i32>} : memref<8x128xf32, #tpu.memory_space<vmem>>, vector<8x128xf32>,
    %c0_72 = arith.constant 0 : index
    %c0_73 = arith.constant 0 : index
    %162 = vector.load %arg4[%c0_72, %c0_73] : memref<8x128xf32, #tpu.memory_space<vmem>>, vector<8x128xf32>
    tpu.vector_store %arg4[%c0_72, %c0_73], %160 {strides = array<i32>} : memref<8x128xf32, #tpu.memory_space<vmem>>, vector<8x128xf32>,
    %163 = arith.truncf %160 : vector<8x128xf32> to vector<8x128xbf16>
    %164 = arith.index_cast %c3_i32 : i32 to index
    %c0_74 = arith.constant 0 : index
    %c0_75 = arith.constant 0 : index
    %165 = vector.load %arg3[%164, %c0_74, %c0_75] : memref<8x8x128xbf16, #tpu.memory_space<vmem>>, vector<1x8x128xbf16>
    %166 = vector.shape_cast %165 : vector<1x8x128xbf16> to vector<8x128xbf16>
    %167 = vector.shape_cast %163 : vector<8x128xbf16> to vector<1x8x128xbf16>
    tpu.vector_store %arg3[%164, %c0_74, %c0_75], %167 {strides = array<i32>} : memref<8x8x128xbf16, #tpu.memory_space<vmem>>, vector<1x8x128xbf16>,
    %c4_i32 = arith.constant 4 : i32
    %c0_76 = arith.constant 0 : index
    %c0_77 = arith.constant 0 : index
    %168 = vector.load %arg4[%c0_76, %c0_77] : memref<8x128xf32, #tpu.memory_space<vmem>>, vector<8x128xf32>
    %c0_78 = arith.constant 0 : index
    %c0_79 = arith.constant 0 : index
    %169 = vector.load %arg5[%c0_78, %c0_79] : memref<8x128xf32, #tpu.memory_space<vmem>>, vector<8x128xf32>
    %170 = arith.index_cast %c4_i32 : i32 to index
    %c0_80 = arith.constant 0 : index
    %c0_81 = arith.constant 0 : index
    %171 = vector.load %arg1[%170, %c0_80, %c0_81] : memref<8x8x512xf32, #tpu.memory_space<vmem>>, vector<1x8x512xf32>
    %172 = vector.shape_cast %171 : vector<1x8x512xf32> to vector<8x512xf32>
    %173 = arith.truncf %168 : vector<8x128xf32> to vector<8x128xbf16>
    %c0_82 = arith.constant 0 : index
    %c0_83 = arith.constant 0 : index
    %174 = vector.load %arg2[%c0_82, %c0_83] : memref<128x512xbf16, #tpu.memory_space<vmem>>, vector<128x512xbf16>
    %cst_84 = arith.constant dense<0.000000e+00> : vector<8x512xf32>
    %175 = tpu.matmul %173, %174, %cst_84 {dimension_numbers = #tpu.dot_dimension_numbers<[1], [0], [0], [1], [0, 0, 1, 1], [], []>} : vector<8x128xbf16>, vector<128x512xbf16>, vector<8x512xf32> -> vector<8x512xf32>
    %176 = arith.addf %172, %175 : vector<8x512xf32>
    %177 = vector.extract_strided_slice %176 {offsets = [0, 0], sizes = [8, 128], strides = [1, 1]} : vector<8x512xf32> to vector<8x128xf32>
    %178 = arith.negf %177 : vector<8x128xf32>
    %179 = math.exp %178 : vector<8x128xf32>
    %cst_85 = arith.constant 1.000000e+00 : f32
    %180 = vector.broadcast %cst_85 : f32 to vector<8x128xf32>
    %181 = arith.addf %180, %179 : vector<8x128xf32>
    %182 = arith.divf %180, %181 : vector<8x128xf32>
    %183 = vector.extract_strided_slice %176 {offsets = [0, 128], sizes = [8, 128], strides = [1, 1]} : vector<8x512xf32> to vector<8x128xf32>
    %184 = arith.negf %183 : vector<8x128xf32>
    %185 = math.exp %184 : vector<8x128xf32>
    %cst_86 = arith.constant 1.000000e+00 : f32
    %186 = vector.broadcast %cst_86 : f32 to vector<8x128xf32>
    %187 = arith.addf %186, %185 : vector<8x128xf32>
    %188 = arith.divf %186, %187 : vector<8x128xf32>
    %189 = vector.extract_strided_slice %176 {offsets = [0, 256], sizes = [8, 128], strides = [1, 1]} : vector<8x512xf32> to vector<8x128xf32>
    %190 = math.tanh %189 : vector<8x128xf32>
    %191 = vector.extract_strided_slice %176 {offsets = [0, 384], sizes = [8, 128], strides = [1, 1]} : vector<8x512xf32> to vector<8x128xf32>
    %192 = arith.negf %191 : vector<8x128xf32>
    %193 = math.exp %192 : vector<8x128xf32>
    %cst_87 = arith.constant 1.000000e+00 : f32
    %194 = vector.broadcast %cst_87 : f32 to vector<8x128xf32>
    %195 = arith.addf %194, %193 : vector<8x128xf32>
    %196 = arith.divf %194, %195 : vector<8x128xf32>
    %197 = arith.mulf %188, %169 : vector<8x128xf32>
    %198 = arith.mulf %182, %190 : vector<8x128xf32>
    %199 = arith.addf %197, %198 : vector<8x128xf32>
    %200 = math.tanh %199 : vector<8x128xf32>
    %201 = arith.mulf %196, %200 : vector<8x128xf32>
    %c0_88 = arith.constant 0 : index
    %c0_89 = arith.constant 0 : index
    %202 = vector.load %arg5[%c0_88, %c0_89] : memref<8x128xf32, #tpu.memory_space<vmem>>, vector<8x128xf32>
    tpu.vector_store %arg5[%c0_88, %c0_89], %199 {strides = array<i32>} : memref<8x128xf32, #tpu.memory_space<vmem>>, vector<8x128xf32>,
    %c0_90 = arith.constant 0 : index
    %c0_91 = arith.constant 0 : index
    %203 = vector.load %arg4[%c0_90, %c0_91] : memref<8x128xf32, #tpu.memory_space<vmem>>, vector<8x128xf32>
    tpu.vector_store %arg4[%c0_90, %c0_91], %201 {strides = array<i32>} : memref<8x128xf32, #tpu.memory_space<vmem>>, vector<8x128xf32>,
    %204 = arith.truncf %201 : vector<8x128xf32> to vector<8x128xbf16>
    %205 = arith.index_cast %c4_i32 : i32 to index
    %c0_92 = arith.constant 0 : index
    %c0_93 = arith.constant 0 : index
    %206 = vector.load %arg3[%205, %c0_92, %c0_93] : memref<8x8x128xbf16, #tpu.memory_space<vmem>>, vector<1x8x128xbf16>
    %207 = vector.shape_cast %206 : vector<1x8x128xbf16> to vector<8x128xbf16>
    %208 = vector.shape_cast %204 : vector<8x128xbf16> to vector<1x8x128xbf16>
    tpu.vector_store %arg3[%205, %c0_92, %c0_93], %208 {strides = array<i32>} : memref<8x8x128xbf16, #tpu.memory_space<vmem>>, vector<1x8x128xbf16>,
    %c5_i32 = arith.constant 5 : i32
    %c0_94 = arith.constant 0 : index
    %c0_95 = arith.constant 0 : index
    %209 = vector.load %arg4[%c0_94, %c0_95] : memref<8x128xf32, #tpu.memory_space<vmem>>, vector<8x128xf32>
    %c0_96 = arith.constant 0 : index
    %c0_97 = arith.constant 0 : index
    %210 = vector.load %arg5[%c0_96, %c0_97] : memref<8x128xf32, #tpu.memory_space<vmem>>, vector<8x128xf32>
    %211 = arith.index_cast %c5_i32 : i32 to index
    %c0_98 = arith.constant 0 : index
    %c0_99 = arith.constant 0 : index
    %212 = vector.load %arg1[%211, %c0_98, %c0_99] : memref<8x8x512xf32, #tpu.memory_space<vmem>>, vector<1x8x512xf32>
    %213 = vector.shape_cast %212 : vector<1x8x512xf32> to vector<8x512xf32>
    %214 = arith.truncf %209 : vector<8x128xf32> to vector<8x128xbf16>
    %c0_100 = arith.constant 0 : index
    %c0_101 = arith.constant 0 : index
    %215 = vector.load %arg2[%c0_100, %c0_101] : memref<128x512xbf16, #tpu.memory_space<vmem>>, vector<128x512xbf16>
    %cst_102 = arith.constant dense<0.000000e+00> : vector<8x512xf32>
    %216 = tpu.matmul %214, %215, %cst_102 {dimension_numbers = #tpu.dot_dimension_numbers<[1], [0], [0], [1], [0, 0, 1, 1], [], []>} : vector<8x128xbf16>, vector<128x512xbf16>, vector<8x512xf32> -> vector<8x512xf32>
    %217 = arith.addf %213, %216 : vector<8x512xf32>
    %218 = vector.extract_strided_slice %217 {offsets = [0, 0], sizes = [8, 128], strides = [1, 1]} : vector<8x512xf32> to vector<8x128xf32>
    %219 = arith.negf %218 : vector<8x128xf32>
    %220 = math.exp %219 : vector<8x128xf32>
    %cst_103 = arith.constant 1.000000e+00 : f32
    %221 = vector.broadcast %cst_103 : f32 to vector<8x128xf32>
    %222 = arith.addf %221, %220 : vector<8x128xf32>
    %223 = arith.divf %221, %222 : vector<8x128xf32>
    %224 = vector.extract_strided_slice %217 {offsets = [0, 128], sizes = [8, 128], strides = [1, 1]} : vector<8x512xf32> to vector<8x128xf32>
    %225 = arith.negf %224 : vector<8x128xf32>
    %226 = math.exp %225 : vector<8x128xf32>
    %cst_104 = arith.constant 1.000000e+00 : f32
    %227 = vector.broadcast %cst_104 : f32 to vector<8x128xf32>
    %228 = arith.addf %227, %226 : vector<8x128xf32>
    %229 = arith.divf %227, %228 : vector<8x128xf32>
    %230 = vector.extract_strided_slice %217 {offsets = [0, 256], sizes = [8, 128], strides = [1, 1]} : vector<8x512xf32> to vector<8x128xf32>
    %231 = math.tanh %230 : vector<8x128xf32>
    %232 = vector.extract_strided_slice %217 {offsets = [0, 384], sizes = [8, 128], strides = [1, 1]} : vector<8x512xf32> to vector<8x128xf32>
    %233 = arith.negf %232 : vector<8x128xf32>
    %234 = math.exp %233 : vector<8x128xf32>
    %cst_105 = arith.constant 1.000000e+00 : f32
    %235 = vector.broadcast %cst_105 : f32 to vector<8x128xf32>
    %236 = arith.addf %235, %234 : vector<8x128xf32>
    %237 = arith.divf %235, %236 : vector<8x128xf32>
    %238 = arith.mulf %229, %210 : vector<8x128xf32>
    %239 = arith.mulf %223, %231 : vector<8x128xf32>
    %240 = arith.addf %238, %239 : vector<8x128xf32>
    %241 = math.tanh %240 : vector<8x128xf32>
    %242 = arith.mulf %237, %241 : vector<8x128xf32>
    %c0_106 = arith.constant 0 : index
    %c0_107 = arith.constant 0 : index
    %243 = vector.load %arg5[%c0_106, %c0_107] : memref<8x128xf32, #tpu.memory_space<vmem>>, vector<8x128xf32>
    tpu.vector_store %arg5[%c0_106, %c0_107], %240 {strides = array<i32>} : memref<8x128xf32, #tpu.memory_space<vmem>>, vector<8x128xf32>,
    %c0_108 = arith.constant 0 : index
    %c0_109 = arith.constant 0 : index
    %244 = vector.load %arg4[%c0_108, %c0_109] : memref<8x128xf32, #tpu.memory_space<vmem>>, vector<8x128xf32>
    tpu.vector_store %arg4[%c0_108, %c0_109], %242 {strides = array<i32>} : memref<8x128xf32, #tpu.memory_space<vmem>>, vector<8x128xf32>,
    %245 = arith.truncf %242 : vector<8x128xf32> to vector<8x128xbf16>
    %246 = arith.index_cast %c5_i32 : i32 to index
    %c0_110 = arith.constant 0 : index
    %c0_111 = arith.constant 0 : index
    %247 = vector.load %arg3[%246, %c0_110, %c0_111] : memref<8x8x128xbf16, #tpu.memory_space<vmem>>, vector<1x8x128xbf16>
    %248 = vector.shape_cast %247 : vector<1x8x128xbf16> to vector<8x128xbf16>
    %249 = vector.shape_cast %245 : vector<8x128xbf16> to vector<1x8x128xbf16>
    tpu.vector_store %arg3[%246, %c0_110, %c0_111], %249 {strides = array<i32>} : memref<8x8x128xbf16, #tpu.memory_space<vmem>>, vector<1x8x128xbf16>,
    %c6_i32 = arith.constant 6 : i32
    %c0_112 = arith.constant 0 : index
    %c0_113 = arith.constant 0 : index
    %250 = vector.load %arg4[%c0_112, %c0_113] : memref<8x128xf32, #tpu.memory_space<vmem>>, vector<8x128xf32>
    %c0_114 = arith.constant 0 : index
    %c0_115 = arith.constant 0 : index
    %251 = vector.load %arg5[%c0_114, %c0_115] : memref<8x128xf32, #tpu.memory_space<vmem>>, vector<8x128xf32>
    %252 = arith.index_cast %c6_i32 : i32 to index
    %c0_116 = arith.constant 0 : index
    %c0_117 = arith.constant 0 : index
    %253 = vector.load %arg1[%252, %c0_116, %c0_117] : memref<8x8x512xf32, #tpu.memory_space<vmem>>, vector<1x8x512xf32>
    %254 = vector.shape_cast %253 : vector<1x8x512xf32> to vector<8x512xf32>
    %255 = arith.truncf %250 : vector<8x128xf32> to vector<8x128xbf16>
    %c0_118 = arith.constant 0 : index
    %c0_119 = arith.constant 0 : index
    %256 = vector.load %arg2[%c0_118, %c0_119] : memref<128x512xbf16, #tpu.memory_space<vmem>>, vector<128x512xbf16>
    %cst_120 = arith.constant dense<0.000000e+00> : vector<8x512xf32>
    %257 = tpu.matmul %255, %256, %cst_120 {dimension_numbers = #tpu.dot_dimension_numbers<[1], [0], [0], [1], [0, 0, 1, 1], [], []>} : vector<8x128xbf16>, vector<128x512xbf16>, vector<8x512xf32> -> vector<8x512xf32>
    %258 = arith.addf %254, %257 : vector<8x512xf32>
    %259 = vector.extract_strided_slice %258 {offsets = [0, 0], sizes = [8, 128], strides = [1, 1]} : vector<8x512xf32> to vector<8x128xf32>
    %260 = arith.negf %259 : vector<8x128xf32>
    %261 = math.exp %260 : vector<8x128xf32>
    %cst_121 = arith.constant 1.000000e+00 : f32
    %262 = vector.broadcast %cst_121 : f32 to vector<8x128xf32>
    %263 = arith.addf %262, %261 : vector<8x128xf32>
    %264 = arith.divf %262, %263 : vector<8x128xf32>
    %265 = vector.extract_strided_slice %258 {offsets = [0, 128], sizes = [8, 128], strides = [1, 1]} : vector<8x512xf32> to vector<8x128xf32>
    %266 = arith.negf %265 : vector<8x128xf32>
    %267 = math.exp %266 : vector<8x128xf32>
    %cst_122 = arith.constant 1.000000e+00 : f32
    %268 = vector.broadcast %cst_122 : f32 to vector<8x128xf32>
    %269 = arith.addf %268, %267 : vector<8x128xf32>
    %270 = arith.divf %268, %269 : vector<8x128xf32>
    %271 = vector.extract_strided_slice %258 {offsets = [0, 256], sizes = [8, 128], strides = [1, 1]} : vector<8x512xf32> to vector<8x128xf32>
    %272 = math.tanh %271 : vector<8x128xf32>
    %273 = vector.extract_strided_slice %258 {offsets = [0, 384], sizes = [8, 128], strides = [1, 1]} : vector<8x512xf32> to vector<8x128xf32>
    %274 = arith.negf %273 : vector<8x128xf32>
    %275 = math.exp %274 : vector<8x128xf32>
    %cst_123 = arith.constant 1.000000e+00 : f32
    %276 = vector.broadcast %cst_123 : f32 to vector<8x128xf32>
    %277 = arith.addf %276, %275 : vector<8x128xf32>
    %278 = arith.divf %276, %277 : vector<8x128xf32>
    %279 = arith.mulf %270, %251 : vector<8x128xf32>
    %280 = arith.mulf %264, %272 : vector<8x128xf32>
    %281 = arith.addf %279, %280 : vector<8x128xf32>
    %282 = math.tanh %281 : vector<8x128xf32>
    %283 = arith.mulf %278, %282 : vector<8x128xf32>
    %c0_124 = arith.constant 0 : index
    %c0_125 = arith.constant 0 : index
    %284 = vector.load %arg5[%c0_124, %c0_125] : memref<8x128xf32, #tpu.memory_space<vmem>>, vector<8x128xf32>
    tpu.vector_store %arg5[%c0_124, %c0_125], %281 {strides = array<i32>} : memref<8x128xf32, #tpu.memory_space<vmem>>, vector<8x128xf32>,
    %c0_126 = arith.constant 0 : index
    %c0_127 = arith.constant 0 : index
    %285 = vector.load %arg4[%c0_126, %c0_127] : memref<8x128xf32, #tpu.memory_space<vmem>>, vector<8x128xf32>
    tpu.vector_store %arg4[%c0_126, %c0_127], %283 {strides = array<i32>} : memref<8x128xf32, #tpu.memory_space<vmem>>, vector<8x128xf32>,
    %286 = arith.truncf %283 : vector<8x128xf32> to vector<8x128xbf16>
    %287 = arith.index_cast %c6_i32 : i32 to index
    %c0_128 = arith.constant 0 : index
    %c0_129 = arith.constant 0 : index
    %288 = vector.load %arg3[%287, %c0_128, %c0_129] : memref<8x8x128xbf16, #tpu.memory_space<vmem>>, vector<1x8x128xbf16>
    %289 = vector.shape_cast %288 : vector<1x8x128xbf16> to vector<8x128xbf16>
    %290 = vector.shape_cast %286 : vector<8x128xbf16> to vector<1x8x128xbf16>
    tpu.vector_store %arg3[%287, %c0_128, %c0_129], %290 {strides = array<i32>} : memref<8x8x128xbf16, #tpu.memory_space<vmem>>, vector<1x8x128xbf16>,
    %c7_i32 = arith.constant 7 : i32
    %c0_130 = arith.constant 0 : index
    %c0_131 = arith.constant 0 : index
    %291 = vector.load %arg4[%c0_130, %c0_131] : memref<8x128xf32, #tpu.memory_space<vmem>>, vector<8x128xf32>
    %c0_132 = arith.constant 0 : index
    %c0_133 = arith.constant 0 : index
    %292 = vector.load %arg5[%c0_132, %c0_133] : memref<8x128xf32, #tpu.memory_space<vmem>>, vector<8x128xf32>
    %293 = arith.index_cast %c7_i32 : i32 to index
    %c0_134 = arith.constant 0 : index
    %c0_135 = arith.constant 0 : index
    %294 = vector.load %arg1[%293, %c0_134, %c0_135] : memref<8x8x512xf32, #tpu.memory_space<vmem>>, vector<1x8x512xf32>
    %295 = vector.shape_cast %294 : vector<1x8x512xf32> to vector<8x512xf32>
    %296 = arith.truncf %291 : vector<8x128xf32> to vector<8x128xbf16>
    %c0_136 = arith.constant 0 : index
    %c0_137 = arith.constant 0 : index
    %297 = vector.load %arg2[%c0_136, %c0_137] : memref<128x512xbf16, #tpu.memory_space<vmem>>, vector<128x512xbf16>
    %cst_138 = arith.constant dense<0.000000e+00> : vector<8x512xf32>
    %298 = tpu.matmul %296, %297, %cst_138 {dimension_numbers = #tpu.dot_dimension_numbers<[1], [0], [0], [1], [0, 0, 1, 1], [], []>} : vector<8x128xbf16>, vector<128x512xbf16>, vector<8x512xf32> -> vector<8x512xf32>
    %299 = arith.addf %295, %298 : vector<8x512xf32>
    %300 = vector.extract_strided_slice %299 {offsets = [0, 0], sizes = [8, 128], strides = [1, 1]} : vector<8x512xf32> to vector<8x128xf32>
    %301 = arith.negf %300 : vector<8x128xf32>
    %302 = math.exp %301 : vector<8x128xf32>
    %cst_139 = arith.constant 1.000000e+00 : f32
    %303 = vector.broadcast %cst_139 : f32 to vector<8x128xf32>
    %304 = arith.addf %303, %302 : vector<8x128xf32>
    %305 = arith.divf %303, %304 : vector<8x128xf32>
    %306 = vector.extract_strided_slice %299 {offsets = [0, 128], sizes = [8, 128], strides = [1, 1]} : vector<8x512xf32> to vector<8x128xf32>
    %307 = arith.negf %306 : vector<8x128xf32>
    %308 = math.exp %307 : vector<8x128xf32>
    %cst_140 = arith.constant 1.000000e+00 : f32
    %309 = vector.broadcast %cst_140 : f32 to vector<8x128xf32>
    %310 = arith.addf %309, %308 : vector<8x128xf32>
    %311 = arith.divf %309, %310 : vector<8x128xf32>
    %312 = vector.extract_strided_slice %299 {offsets = [0, 256], sizes = [8, 128], strides = [1, 1]} : vector<8x512xf32> to vector<8x128xf32>
    %313 = math.tanh %312 : vector<8x128xf32>
    %314 = vector.extract_strided_slice %299 {offsets = [0, 384], sizes = [8, 128], strides = [1, 1]} : vector<8x512xf32> to vector<8x128xf32>
    %315 = arith.negf %314 : vector<8x128xf32>
    %316 = math.exp %315 : vector<8x128xf32>
    %cst_141 = arith.constant 1.000000e+00 : f32
    %317 = vector.broadcast %cst_141 : f32 to vector<8x128xf32>
    %318 = arith.addf %317, %316 : vector<8x128xf32>
    %319 = arith.divf %317, %318 : vector<8x128xf32>
    %320 = arith.mulf %311, %292 : vector<8x128xf32>
    %321 = arith.mulf %305, %313 : vector<8x128xf32>
    %322 = arith.addf %320, %321 : vector<8x128xf32>
    %323 = math.tanh %322 : vector<8x128xf32>
    %324 = arith.mulf %319, %323 : vector<8x128xf32>
    %c0_142 = arith.constant 0 : index
    %c0_143 = arith.constant 0 : index
    %325 = vector.load %arg5[%c0_142, %c0_143] : memref<8x128xf32, #tpu.memory_space<vmem>>, vector<8x128xf32>
    tpu.vector_store %arg5[%c0_142, %c0_143], %322 {strides = array<i32>} : memref<8x128xf32, #tpu.memory_space<vmem>>, vector<8x128xf32>,
    %c0_144 = arith.constant 0 : index
    %c0_145 = arith.constant 0 : index
    %326 = vector.load %arg4[%c0_144, %c0_145] : memref<8x128xf32, #tpu.memory_space<vmem>>, vector<8x128xf32>
    tpu.vector_store %arg4[%c0_144, %c0_145], %324 {strides = array<i32>} : memref<8x128xf32, #tpu.memory_space<vmem>>, vector<8x128xf32>,
    %327 = arith.truncf %324 : vector<8x128xf32> to vector<8x128xbf16>
    %328 = arith.index_cast %c7_i32 : i32 to index
    %c0_146 = arith.constant 0 : index
    %c0_147 = arith.constant 0 : index
    %329 = vector.load %arg3[%328, %c0_146, %c0_147] : memref<8x8x128xbf16, #tpu.memory_space<vmem>>, vector<1x8x128xbf16>
    %330 = vector.shape_cast %329 : vector<1x8x128xbf16> to vector<8x128xbf16>
    %331 = vector.shape_cast %327 : vector<8x128xbf16> to vector<1x8x128xbf16>
    tpu.vector_store %arg3[%328, %c0_146, %c0_147], %331 {strides = array<i32>} : memref<8x8x128xbf16, #tpu.memory_space<vmem>>, vector<1x8x128xbf16>,
    %c8_i32 = arith.constant 8 : i32
    return
  }
  func.func @transform_0(%arg0: i32) -> (i32, i32, i32) {
    %c0_i32 = arith.constant 0 : i32
    %c0_i32_0 = arith.constant 0 : i32
    %c0_i32_1 = arith.constant 0 : i32
    %c0_i32_2 = arith.constant 0 : i32
    return %c0_i32, %c0_i32_0, %c0_i32_1 : i32, i32, i32
  }
  func.func @transform_1(%arg0: i32) -> (i32, i32) {
    %c0_i32 = arith.constant 0 : i32
    %c0_i32_0 = arith.constant 0 : i32
    %c0_i32_1 = arith.constant 0 : i32
    return %c0_i32, %c0_i32_0 : i32, i32
  }
  func.func @transform_2(%arg0: i32) -> (i32, i32, i32) {
    %c0_i32 = arith.constant 0 : i32
    %c0_i32_0 = arith.constant 0 : i32
    %c0_i32_1 = arith.constant 0 : i32
    %c0_i32_2 = arith.constant 0 : i32
    return %c0_i32, %c0_i32_0, %c0_i32_1 : i32, i32, i32
  }
}

</mosaic_0001>

<bundles_post_ra>
// kernel: decoder_forward.5
= control target key start
LH: loop header
LB: loop body
LE: loop exit
PB: predicated region body
PF: predicated region fallthrough
CT: control target
= control target key end

     0   :  { %s355_s1 = inlined_call_operand.vmem [shape: bf16[128,128], index: 1, kind: input, shape index: {}]   ;;  %s356_s0 = inlined_call_operand.vmem [shape: bf16[64,128], index: 0, kind: input, shape index: {}]   ;;  %s357_s2 = inlined_call_operand.vmem [shape: f32[1,128], index: 2, kind: input, shape index: {}]   ;;  %s358_s3 = inlined_call_operand.vmem [shape: f32[64,128], index: 3, kind: output, shape index: {}]  }
   0x1   :  { %v260_v0 = vld [vmem:[%s355_s1] sm:$0xff]   ;;  %v261_v1 = vld [vmem:[%s355_s1 + $0x8] sm:$0xff]   ;;  %v262_v2 = vld [vmem:[%s355_s1 + $0x10] sm:$0xff]  }
   0x2   :  { %220 = vmatprep.subr.bf16.mxu0 %v260_v0  ;;  %244 = vmatprep.subr.bf16.mxu1 %v260_v0  ;;  %v263_v3 = vld [vmem:[%s355_s1 + $0x18] sm:$0xff]   ;;  %v268_v4 = vld [vmem:[%s356_s0] sm:$0xff]   ;;  %v269_v5 = vld [vmem:[%s356_s0 + $0x10] sm:$0xff]  }
   0x3   :  { %221 = vmatpush3.bf16.msra.mxu0 %v260_v0  ;;  %252 = vmatpush3.bf16.msra.mxu1 %v260_v0  ;;  %v264_v6 = vld [vmem:[%s355_s1 + $0x20] sm:$0xff]   ;;  %v265_v7 = vld [vmem:[%s355_s1 + $0x28] sm:$0xff]   ;;  %v266_v8 = vld [vmem:[%s355_s1 + $0x30] sm:$0xff]  }
   0x4   :  { %222 = vmatprep.subr.bf16.mxu0 %v261_v1  ;;  %245 = vmatprep.subr.bf16.mxu1 %v261_v1  ;;  %v267_v9 = vld [vmem:[%s355_s1 + $0x38] sm:$0xff]   ;;  %v270_v10 = vld [vmem:[%s356_s0 + $0x8] sm:$0xff]   ;;  %v195_v12 = vld [vmem:[%s357_s2] ss:$0 sm:$0xff] }
   0x5   :  { %236 = vmatprep.mubr.bf16.mxu0 %v268_v4  ;;  %240 = vmatprep.mubr.bf16.mxu1 %v269_v5  ;;  %v271_v11 = vld [vmem:[%s356_s0 + $0x18] sm:$0xff]  }
   0x7   :  { %223 = vmatpush3.bf16.msra.mxu0 %v261_v1  ;;  %253 = vmatpush3.bf16.msra.mxu1 %v261_v1 }
   0x8   :  { %224 = vmatprep.subr.bf16.mxu0 %v262_v2  ;;  %246 = vmatprep.subr.bf16.mxu1 %v262_v2 }
   0xb   :  { %225 = vmatpush3.bf16.msra.mxu0 %v262_v2  ;;  %254 = vmatpush3.bf16.msra.mxu1 %v262_v2 }
   0xc   :  { %226 = vmatprep.subr.bf16.mxu0 %v263_v3  ;;  %247 = vmatprep.subr.bf16.mxu1 %v263_v3 }
   0xf   :  { %227 = vmatpush3.bf16.msra.mxu0 %v263_v3  ;;  %255 = vmatpush3.bf16.msra.mxu1 %v263_v3 }
  0x10   :  { %228 = vmatprep.subr.bf16.mxu0 %v264_v6  ;;  %248 = vmatprep.subr.bf16.mxu1 %v264_v6 }
  0x13   :  { %229 = vmatpush3.bf16.msra.mxu0 %v264_v6  ;;  %256 = vmatpush3.bf16.msra.mxu1 %v264_v6 }
  0x14   :  { %230 = vmatprep.subr.bf16.mxu0 %v265_v7  ;;  %249 = vmatprep.subr.bf16.mxu1 %v265_v7 }
  0x17   :  { %231 = vmatpush3.bf16.msra.mxu0 %v265_v7  ;;  %257 = vmatpush3.bf16.msra.mxu1 %v265_v7 }
  0x18   :  { %232 = vmatprep.subr.bf16.mxu0 %v266_v8  ;;  %250 = vmatprep.subr.bf16.mxu1 %v266_v8 }
  0x1b   :  { %233 = vmatpush3.bf16.msra.mxu0 %v266_v8  ;;  %258 = vmatpush3.bf16.msra.mxu1 %v266_v8 }
  0x1c   :  { %234 = vmatprep.subr.bf16.mxu0 %v267_v9  ;;  %251 = vmatprep.subr.bf16.mxu1 %v267_v9 }
  0x1f   :  { %235 = vmatpush3.bf16.msra.mxu0 %v267_v9  ;;  %259 = vmatpush3.bf16.msra.mxu1 %v267_v9 }
  0x22   :  { %237 = vmatmul.mubr.bf16.vlgmr.msra.gmra.mrb[0].mxu0 %v270_v10  ;;  %241 = vmatmul.mubr.bf16.vlgmr.msra.gmra.mrb[0].mxu1 %v271_v11 }
  0xf5   :  { %v238_v13 = vpop.f32.mrb[0].mxu0  ;;  %v242_v14 = vpop.f32.mrb[0].mxu1 }
  0xf6   :  { %v161_v15 = vadd.f32 %v238_v13, %v195_v12  ;;  %v177_v16 = vadd.f32 %v242_v14, %v195_v12  ;;  %v152_v17 = vpop.f32.mrb[1].mxu0  ;;  %v168_v18 = vpop.f32.mrb[1].mxu1 }
  0xf7   :  { %v153_v19 = vadd.f32 %v195_v12, %v152_v17  ;;  %v169_v20 = vadd.f32 %v195_v12, %v168_v18  ;;  %v239_v21 = vpop.f32.mrb[2].mxu0  ;;  %v243_v22 = vpop.f32.mrb[2].mxu1 }
  0xf8   :  { %185 = vst [vmem:[%s358_s3 + $0x10] sm:$0xff] %v161_v15  ;;  %189 = vst [vmem:[%s358_s3 + $0x30] sm:$0xff] %v177_v16  ;;  %v164_v23 = vadd.f32 %v239_v21, %v195_v12  ;;  %v180_v24 = vadd.f32 %v243_v22, %v195_v12  ;;  %v155_v25 = vpop.f32.mrb[3].mxu0  ;;  %v171_v26 = vpop.f32.mrb[3].mxu1 }
  0xf9   :  { %183 = vst [vmem:[%s358_s3] sm:$0xff] %v153_v19  ;;  %187 = vst [vmem:[%s358_s3 + $0x20] sm:$0xff] %v169_v20  ;;  %v156_v27 = vadd.f32 %v195_v12, %v155_v25  ;;  %v172_v28 = vadd.f32 %v195_v12, %v171_v26 }
  0xfa   :  { %186 = vst [vmem:[%s358_s3 + $0x18] sm:$0xff] %v164_v23  ;;  %190 = vst [vmem:[%s358_s3 + $0x38] sm:$0xff] %v180_v24 }
  0xfb   :  { %184 = vst [vmem:[%s358_s3 + $0x8] sm:$0xff] %v156_v27  ;;  %188 = vst [vmem:[%s358_s3 + $0x28] sm:$0xff] %v172_v28 }

// kernel: decoder_forward.3
= control target key start
LH: loop header
LB: loop body
LE: loop exit
PB: predicated region body
PF: predicated region fallthrough
CT: control target
= control target key end

     0   :  { %v532_v1 = vmov 0   ;;  %v57_v37 = vlaneseq  ;;  %s808_s1 = inlined_call_operand.vmem [shape: bf16[128,512], index: 1, kind: input, shape index: {}]   ;;  %s809_s0 = inlined_call_operand.vmem [shape: bf16[64,128], index: 0, kind: input, shape index: {}]   ;;  %s810_s2 = inlined_call_operand.vmem [shape: f32[1,512], index: 2, kind: input, shape index: {}]   ;;  %s811_s3 = inlined_call_operand.vmem [shape: f32[64,512], index: 3, kind: output, shape index: {}]  }
   0x1   :  { %v480_v0 = vld [vmem:[%s808_s1 + $0x4] ss:$16 sps:$4 sm:$0xff]   ;;  %293 = vmatprep.mubr.bf16.mxu0 %v532_v1  ;;  %366 = vmatprep.mubr.bf16.mxu1 %v532_v1  ;;  %v482_v2 = vld [vmem:[%s808_s1 + $0xc] ss:$16 sps:$4 sm:$0xff]   ;;  %v484_v3 = vld [vmem:[%s808_s1] ss:$16 sps:$4 sm:$0xff]  }
   0x2   :  { %261 = vmatprep.subr.bf16.mxu0 %v480_v0  ;;  %v485_v4 = vld [vmem:[%s808_s1 + $0x8] ss:$16 sps:$4 sm:$0xff]   ;;  %334 = vmatprep.subr.bf16.mxu1 %v482_v2  ;;  %v486_v5 = vld [vmem:[%s808_s1 + $0x24] ss:$16 sps:$4 sm:$0xff]   ;;  %v488_v6 = vld [vmem:[%s808_s1 + $0x2c] ss:$16 sps:$4 sm:$0xff]  }
   0x3   :  { %262 = vmatpush1.bf16.msra.mxu0 %v484_v3  ;;  %335 = vmatpush1.bf16.msra.mxu1 %v485_v4  ;;  %v490_v7 = vld [vmem:[%s808_s1 + $0x20] ss:$16 sps:$4 sm:$0xff]   ;;  %v491_v8 = vld [vmem:[%s808_s1 + $0x28] ss:$16 sps:$4 sm:$0xff]   ;;  %v492_v9 = vld [vmem:[%s808_s1 + $0x44] ss:$16 sps:$4 sm:$0xff]  }
   0x4   :  { %263 = vmatprep.subr.bf16.mxu0 %v486_v5  ;;  %336 = vmatprep.subr.bf16.mxu1 %v488_v6  ;;  %v494_v10 = vld [vmem:[%s808_s1 + $0x4c] ss:$16 sps:$4 sm:$0xff]   ;;  %v496_v11 = vld [vmem:[%s808_s1 + $0x40] ss:$16 sps:$4 sm:$0xff]   ;;  %v497_v12 = vld [vmem:[%s808_s1 + $0x48] ss:$16 sps:$4 sm:$0xff]  }
   0x5   :  { %v498_v13 = vld [vmem:[%s808_s1 + $0x64] ss:$16 sps:$4 sm:$0xff]   ;;  %v500_v14 = vld [vmem:[%s808_s1 + $0x6c] ss:$16 sps:$4 sm:$0xff]   ;;  %v502_v15 = vld [vmem:[%s808_s1 + $0x60] ss:$16 sps:$4 sm:$0xff]  }
   0x6   :  { %v503_v16 = vld [vmem:[%s808_s1 + $0x68] ss:$16 sps:$4 sm:$0xff]   ;;  %v504_v17 = vld [vmem:[%s808_s1 + $0x84] ss:$16 sps:$4 sm:$0xff]   ;;  %v506_v18 = vld [vmem:[%s808_s1 + $0x8c] ss:$16 sps:$4 sm:$0xff]  }
   0x7   :  { %264 = vmatpush1.bf16.msra.mxu0 %v490_v7  ;;  %337 = vmatpush1.bf16.msra.mxu1 %v491_v8  ;;  %v508_v19 = vld [vmem:[%s808_s1 + $0x80] ss:$16 sps:$4 sm:$0xff]   ;;  %v509_v20 = vld [vmem:[%s808_s1 + $0x88] ss:$16 sps:$4 sm:$0xff]   ;;  %v510_v21 = vld [vmem:[%s808_s1 + $0xa4] ss:$16 sps:$4 sm:$0xff]  }
   0x8   :  { %265 = vmatprep.subr.bf16.mxu0 %v492_v9  ;;  %338 = vmatprep.subr.bf16.mxu1 %v494_v10  ;;  %v512_v22 = vld [vmem:[%s808_s1 + $0xac] ss:$16 sps:$4 sm:$0xff]   ;;  %v514_v23 = vld [vmem:[%s808_s1 + $0xa0] ss:$16 sps:$4 sm:$0xff]   ;;  %v515_v24 = vld [vmem:[%s808_s1 + $0xa8] ss:$16 sps:$4 sm:$0xff]  }
   0x9   :  { %v516_v25 = vld [vmem:[%s808_s1 + $0xc4] ss:$16 sps:$4 sm:$0xff]   ;;  %v518_v26 = vld [vmem:[%s808_s1 + $0xcc] ss:$16 sps:$4 sm:$0xff]   ;;  %v520_v27 = vld [vmem:[%s808_s1 + $0xc0] ss:$16 sps:$4 sm:$0xff]  }
   0xa   :  { %v521_v28 = vld [vmem:[%s808_s1 + $0xc8] ss:$16 sps:$4 sm:$0xff]   ;;  %v522_v29 = vld [vmem:[%s808_s1 + $0xe4] ss:$16 sps:$4 sm:$0xff]   ;;  %v524_v30 = vld [vmem:[%s808_s1 + $0xec] ss:$16 sps:$4 sm:$0xff]  }
   0xb   :  { %266 = vmatpush1.bf16.msra.mxu0 %v496_v11  ;;  %339 = vmatpush1.bf16.msra.mxu1 %v497_v12  ;;  %v526_v31 = vld [vmem:[%s808_s1 + $0xe0] ss:$16 sps:$4 sm:$0xff]   ;;  %v527_v32 = vld [vmem:[%s808_s1 + $0xe8] ss:$16 sps:$4 sm:$0xff]   ;;  %v58_v38 = vshrl.u32 %v57_v37, 7 }
   0xc   :  { %267 = vmatprep.subr.bf16.mxu0 %v498_v13  ;;  %340 = vmatprep.subr.bf16.mxu1 %v500_v14  ;;  %v528_v33 = vld [vmem:[%s809_s0] sm:$0xff]   ;;  %v529_v34 = vld [vmem:[%s809_s0 + $0x8] sm:$0xff]   ;;  %v530_v35 = vld [vmem:[%s809_s0 + $0x10] sm:$0xff]  }
   0xd   :  { %v531_v36 = vld [vmem:[%s809_s0 + $0x18] sm:$0xff]   ;;  %v59_v39 = vsub.s32 0, %v58_v38  ;;  %v67_v40 = vsub.s32 2, %v58_v38  ;;  %v55_v41 = vld [vmem:[%s810_s2] sm:$0xf]  ;;  %v63_v42 = vsub.s32 1, %v58_v38 }
   0xe   :  { %v71_v43 = vsub.s32 3, %v58_v38 }
   0xf   :  { %268 = vmatpush1.bf16.msra.mxu0 %v502_v15  ;;  %341 = vmatpush1.bf16.msra.mxu1 %v503_v16  ;;  %v672_v44 = vrot.slane %v55_v41, %v59_v39  ;;  %v674_v45 = vrot.slane %v55_v41, %v67_v40  ;;  %v676_v46 = vrot.slane %v55_v41, %v63_v42 }
  0x10   :  { %269 = vmatprep.subr.bf16.mxu0 %v504_v17  ;;  %342 = vmatprep.subr.bf16.mxu1 %v506_v18  ;;  %v678_v47 = vrot.slane %v55_v41, %v71_v43 }
  0x13   :  { %270 = vmatpush1.bf16.msra.mxu0 %v508_v19  ;;  %343 = vmatpush1.bf16.msra.mxu1 %v509_v20 }
  0x14   :  { %271 = vmatprep.subr.bf16.mxu0 %v510_v21  ;;  %344 = vmatprep.subr.bf16.mxu1 %v512_v22 }
  0x17   :  { %272 = vmatpush1.bf16.msra.mxu0 %v514_v23  ;;  %345 = vmatpush1.bf16.msra.mxu1 %v515_v24 }
  0x18   :  { %273 = vmatprep.subr.bf16.mxu0 %v516_v25  ;;  %346 = vmatprep.subr.bf16.mxu1 %v518_v26 }
  0x1b   :  { %274 = vmatpush1.bf16.msra.mxu0 %v520_v27  ;;  %347 = vmatpush1.bf16.msra.mxu1 %v521_v28 }
  0x1c   :  { %275 = vmatprep.subr.bf16.mxu0 %v522_v29  ;;  %348 = vmatprep.subr.bf16.mxu1 %v524_v30 }
  0x1f   :  { %276 = vmatpush1.bf16.msra.mxu0 %v526_v31  ;;  %349 = vmatpush1.bf16.msra.mxu1 %v527_v32 }
  0x22   :  { %294 = vmatmul.mubr.bf16.vlgmr.msra.gmra.mrb[0].mxu0 %v528_v33  ;;  %367 = vmatmul.mubr.bf16.vlgmr.msra.gmra.mrb[0].mxu1 %v528_v33 }
  0x23   :  { %303 = vmatprep.mubr.bf16.mxu0 %v532_v1  ;;  %376 = vmatprep.mubr.bf16.mxu1 %v532_v1 }
  0x2a   :  { %304 = vmatmul.mubr.bf16.gmra.mrb[4].mxu0 %v529_v34  ;;  %377 = vmatmul.mubr.bf16.gmra.mrb[4].mxu1 %v529_v34 }
  0x2b   :  { %313 = vmatprep.mubr.bf16.mxu0 %v532_v1  ;;  %386 = vmatprep.mubr.bf16.mxu1 %v532_v1 }
  0x32   :  { %314 = vmatmul.mubr.bf16.gmra.mrb[8].mxu0 %v530_v35  ;;  %387 = vmatmul.mubr.bf16.gmra.mrb[8].mxu1 %v530_v35 }
  0x33   :  { %323 = vmatprep.mubr.bf16.mxu0 %v532_v1  ;;  %396 = vmatprep.mubr.bf16.mxu1 %v532_v1 }
  0x3a   :  { %324 = vmatmul.mubr.bf16.gmra.mrb[12].mxu0 %v531_v36  ;;  %397 = vmatmul.mubr.bf16.gmra.mrb[12].mxu1 %v531_v36 }
  0xf5   :  { %v295_v48 = vpop.f32.mrb[0].mxu0  ;;  %v368_v49 = vpop.f32.mrb[0].mxu1 }
  0xf6   :  { %v296_v50 = vadd.f32 %v295_v48, %v672_v44  ;;  %v369_v51 = vadd.f32 %v368_v49, %v674_v45  ;;  %v297_v52 = vpop.f32.mrb[1].mxu0  ;;  %v370_v53 = vpop.f32.mrb[1].mxu1 }
  0xf7   :  { %v298_v54 = vadd.f32 %v297_v52, %v676_v46  ;;  %v371_v55 = vadd.f32 %v370_v53, %v678_v47  ;;  %v299_v56 = vpop.f32.mrb[2].mxu0  ;;  %v372_v57 = vpop.f32.mrb[2].mxu1 }
  0xf8   :  { %407 = vst [vmem:[%s811_s3] sm:$0xff] %v296_v50  ;;  %409 = vst [vmem:[%s811_s3 + $0x10] sm:$0xff] %v369_v51  ;;  %v300_v58 = vadd.f32 %v299_v56, %v672_v44  ;;  %v373_v59 = vadd.f32 %v372_v57, %v674_v45  ;;  %v301_v60 = vpop.f32.mrb[3].mxu0  ;;  %v374_v61 = vpop.f32.mrb[3].mxu1 }
  0xf9   :  { %408 = vst [vmem:[%s811_s3 + $0x8] sm:$0xff] %v298_v54  ;;  %410 = vst [vmem:[%s811_s3 + $0x18] sm:$0xff] %v371_v55  ;;  %v302_v62 = vadd.f32 %v301_v60, %v676_v46  ;;  %v375_v63 = vadd.f32 %v374_v61, %v678_v47 }
  0xfa   :  { %411 = vst [vmem:[%s811_s3 + $0x20] sm:$0xff] %v300_v58  ;;  %413 = vst [vmem:[%s811_s3 + $0x30] sm:$0xff] %v373_v59 }
  0xfb   :  { %412 = vst [vmem:[%s811_s3 + $0x28] sm:$0xff] %v302_v62  ;;  %414 = vst [vmem:[%s811_s3 + $0x38] sm:$0xff] %v375_v63 }
  0xfd   :  { %v305_v0 = vpop.f32.mrb[4].mxu0  ;;  %v378_v1 = vpop.f32.mrb[4].mxu1 }
  0xfe   :  { %v306_v2 = vadd.f32 %v305_v0, %v672_v44  ;;  %v379_v3 = vadd.f32 %v378_v1, %v674_v45  ;;  %v307_v4 = vpop.f32.mrb[5].mxu0  ;;  %v380_v5 = vpop.f32.mrb[5].mxu1 }
  0xff   :  { %v308_v6 = vadd.f32 %v307_v4, %v676_v46  ;;  %v381_v7 = vadd.f32 %v380_v5, %v678_v47  ;;  %v309_v8 = vpop.f32.mrb[6].mxu0  ;;  %v382_v9 = vpop.f32.mrb[6].mxu1 }
 0x100   :  { %415 = vst [vmem:[%s811_s3 + $0x40] sm:$0xff] %v306_v2  ;;  %417 = vst [vmem:[%s811_s3 + $0x50] sm:$0xff] %v379_v3  ;;  %v310_v10 = vadd.f32 %v309_v8, %v672_v44  ;;  %v383_v11 = vadd.f32 %v382_v9, %v674_v45  ;;  %v311_v12 = vpop.f32.mrb[7].mxu0  ;;  %v384_v13 = vpop.f32.mrb[7].mxu1 }
 0x101   :  { %416 = vst [vmem:[%s811_s3 + $0x48] sm:$0xff] %v308_v6  ;;  %418 = vst [vmem:[%s811_s3 + $0x58] sm:$0xff] %v381_v7  ;;  %v312_v14 = vadd.f32 %v311_v12, %v676_v46  ;;  %v385_v15 = vadd.f32 %v384_v13, %v678_v47 }
 0x102   :  { %419 = vst [vmem:[%s811_s3 + $0x60] sm:$0xff] %v310_v10  ;;  %421 = vst [vmem:[%s811_s3 + $0x70] sm:$0xff] %v383_v11 }
 0x103   :  { %420 = vst [vmem:[%s811_s3 + $0x68] sm:$0xff] %v312_v14  ;;  %422 = vst [vmem:[%s811_s3 + $0x78] sm:$0xff] %v385_v15 }
 0x105   :  { %v315_v16 = vpop.f32.mrb[8].mxu0  ;;  %v388_v17 = vpop.f32.mrb[8].mxu1 }
 0x106   :  { %v316_v18 = vadd.f32 %v315_v16, %v672_v44  ;;  %v389_v19 = vadd.f32 %v388_v17, %v674_v45  ;;  %v317_v20 = vpop.f32.mrb[9].mxu0  ;;  %v390_v21 = vpop.f32.mrb[9].mxu1 }
 0x107   :  { %v318_v22 = vadd.f32 %v317_v20, %v676_v46  ;;  %v391_v23 = vadd.f32 %v390_v21, %v678_v47  ;;  %v319_v24 = vpop.f32.mrb[10].mxu0  ;;  %v392_v25 = vpop.f32.mrb[10].mxu1 }
 0x108   :  { %423 = vst [vmem:[%s811_s3 + $0x80] sm:$0xff] %v316_v18  ;;  %425 = vst [vmem:[%s811_s3 + $0x90] sm:$0xff] %v389_v19  ;;  %v320_v26 = vadd.f32 %v319_v24, %v672_v44  ;;  %v393_v27 = vadd.f32 %v392_v25, %v674_v45  ;;  %v321_v28 = vpop.f32.mrb[11].mxu0  ;;  %v394_v29 = vpop.f32.mrb[11].mxu1 }
 0x109   :  { %424 = vst [vmem:[%s811_s3 + $0x88] sm:$0xff] %v318_v22  ;;  %426 = vst [vmem:[%s811_s3 + $0x98] sm:$0xff] %v391_v23  ;;  %v322_v30 = vadd.f32 %v321_v28, %v676_v46  ;;  %v395_v31 = vadd.f32 %v394_v29, %v678_v47 }
 0x10a   :  { %427 = vst [vmem:[%s811_s3 + $0xa0] sm:$0xff] %v320_v26  ;;  %429 = vst [vmem:[%s811_s3 + $0xb0] sm:$0xff] %v393_v27 }
 0x10b   :  { %428 = vst [vmem:[%s811_s3 + $0xa8] sm:$0xff] %v322_v30  ;;  %430 = vst [vmem:[%s811_s3 + $0xb8] sm:$0xff] %v395_v31 }
 0x10d   :  { %v325_v32 = vpop.f32.mrb[12].mxu0  ;;  %v398_v33 = vpop.f32.mrb[12].mxu1 }
 0x10e   :  { %v326_v34 = vadd.f32 %v325_v32, %v672_v44  ;;  %v399_v35 = vadd.f32 %v398_v33, %v674_v45  ;;  %v327_v36 = vpop.f32.mrb[13].mxu0  ;;  %v400_v37 = vpop.f32.mrb[13].mxu1 }
 0x10f   :  { %v328_v38 = vadd.f32 %v327_v36, %v676_v46  ;;  %v401_v39 = vadd.f32 %v400_v37, %v678_v47  ;;  %v329_v40 = vpop.f32.mrb[14].mxu0  ;;  %v402_v41 = vpop.f32.mrb[14].mxu1 }
 0x110   :  { %431 = vst [vmem:[%s811_s3 + $0xc0] sm:$0xff] %v326_v34  ;;  %433 = vst [vmem:[%s811_s3 + $0xd0] sm:$0xff] %v399_v35  ;;  %v330_v42 = vadd.f32 %v329_v40, %v672_v44  ;;  %v403_v43 = vadd.f32 %v402_v41, %v674_v45  ;;  %v331_v48 = vpop.f32.mrb[15].mxu0  ;;  %v404_v49 = vpop.f32.mrb[15].mxu1 }
 0x111   :  { %432 = vst [vmem:[%s811_s3 + $0xc8] sm:$0xff] %v328_v38  ;;  %434 = vst [vmem:[%s811_s3 + $0xd8] sm:$0xff] %v401_v39  ;;  %v332_v50 = vadd.f32 %v331_v48, %v676_v46  ;;  %v405_v51 = vadd.f32 %v404_v49, %v678_v47 }
 0x112   :  { %435 = vst [vmem:[%s811_s3 + $0xe0] sm:$0xff] %v330_v42  ;;  %437 = vst [vmem:[%s811_s3 + $0xf0] sm:$0xff] %v403_v43 }
 0x113   :  { %436 = vst [vmem:[%s811_s3 + $0xe8] sm:$0xff] %v332_v50  ;;  %438 = vst [vmem:[%s811_s3 + $0xf8] sm:$0xff] %v405_v51 }

// kernel: decoder_forward.4
= control target key start
LH: loop header
LB: loop body
LE: loop exit
PB: predicated region body
PF: predicated region fallthrough
CT: control target
= control target key end

     0   :  { %v3077_v1 = vmov 0   ;;  %v3078_v33 = vmov 0.0|0.0   ;;  %s3830_s1 = inlined_call_operand.vmem [shape: bf16[128,512], index: 1, kind: input, shape index: {}]   ;;  %s3831_s0 = inlined_call_operand.vmem [shape: f32[8,8,512], index: 0, kind: input, shape index: {}]   ;;  %s3832_s2 = inlined_call_operand.vmem [shape: bf16[8,8,128], index: 2, kind: output, shape index: {}]  }
   0x1   :  { %v3097_v0 = vld [vmem:[%s3830_s1 + $0x4] ss:$16 sps:$4 sm:$0xff]   ;;  %245 = vmatprep.mubr.bf16.mxu0 %v3077_v1  ;;  %286 = vmatprep.mubr.bf16.mxu1 %v3077_v1  ;;  %v3104_v2 = vld [vmem:[%s3830_s1] ss:$16 sps:$4 sm:$0xff]   ;;  %v3127_v6 = vld [vmem:[%s3830_s1 + $0xc] ss:$16 sps:$4 sm:$0xff]  }
   0x2   :  { %213 = vmatprep.subr.bf16.mxu0 %v3097_v0  ;;  %v3110_v3 = vld [vmem:[%s3830_s1 + $0x24] ss:$16 sps:$4 sm:$0xff]   ;;  %v3116_v4 = vld [vmem:[%s3830_s1 + $0x20] ss:$16 sps:$4 sm:$0xff]   ;;  %v3132_v7 = vld [vmem:[%s3830_s1 + $0x8] ss:$16 sps:$4 sm:$0xff]   ;;  %254 = vmatprep.subr.bf16.mxu1 %v3127_v6 }
   0x3   :  { %214 = vmatpush1.bf16.msra.mxu0 %v3104_v2  ;;  %v3122_v5 = vld [vmem:[%s3830_s1 + $0x44] ss:$16 sps:$4 sm:$0xff]   ;;  %v3138_v8 = vld [vmem:[%s3830_s1 + $0x40] ss:$16 sps:$4 sm:$0xff]   ;;  %255 = vmatpush1.bf16.msra.mxu1 %v3132_v7  ;;  %v3151_v10 = vld [vmem:[%s3830_s1 + $0x2c] ss:$16 sps:$4 sm:$0xff]  }
   0x4   :  { %215 = vmatprep.subr.bf16.mxu0 %v3110_v3  ;;  %v3145_v9 = vld [vmem:[%s3830_s1 + $0x64] ss:$16 sps:$4 sm:$0xff]   ;;  %v3156_v11 = vld [vmem:[%s3830_s1 + $0x28] ss:$16 sps:$4 sm:$0xff]   ;;  %256 = vmatprep.subr.bf16.mxu1 %v3151_v10  ;;  %v3163_v12 = vld [vmem:[%s3830_s1 + $0x60] ss:$16 sps:$4 sm:$0xff]  }
   0x5   :  { %v3168_v13 = vld [vmem:[%s3830_s1 + $0x84] ss:$16 sps:$4 sm:$0xff]   ;;  %v3173_v14 = vld [vmem:[%s3830_s1 + $0x4c] ss:$16 sps:$4 sm:$0xff]   ;;  %v3180_v15 = vld [vmem:[%s3830_s1 + $0x48] ss:$16 sps:$4 sm:$0xff]  }
   0x6   :  { %v3186_v16 = vld [vmem:[%s3830_s1 + $0x6c] ss:$16 sps:$4 sm:$0xff]   ;;  %v3192_v17 = vld [vmem:[%s3830_s1 + $0x80] ss:$16 sps:$4 sm:$0xff]   ;;  %v3198_v18 = vld [vmem:[%s3830_s1 + $0xa4] ss:$16 sps:$4 sm:$0xff]  }
   0x7   :  { %216 = vmatpush1.bf16.msra.mxu0 %v3116_v4  ;;  %257 = vmatpush1.bf16.msra.mxu1 %v3156_v11  ;;  %v3204_v19 = vld [vmem:[%s3830_s1 + $0x68] ss:$16 sps:$4 sm:$0xff]   ;;  %v3210_v20 = vld [vmem:[%s3830_s1 + $0x8c] ss:$16 sps:$4 sm:$0xff]   ;;  %v3216_v21 = vld [vmem:[%s3830_s1 + $0xa0] ss:$16 sps:$4 sm:$0xff]  }
   0x8   :  { %217 = vmatprep.subr.bf16.mxu0 %v3122_v5  ;;  %258 = vmatprep.subr.bf16.mxu1 %v3173_v14  ;;  %v3221_v22 = vld [vmem:[%s3830_s1 + $0xc4] ss:$16 sps:$4 sm:$0xff]   ;;  %v3228_v23 = vld [vmem:[%s3830_s1 + $0x88] ss:$16 sps:$4 sm:$0xff]   ;;  %v3233_v24 = vld [vmem:[%s3830_s1 + $0xc0] ss:$16 sps:$4 sm:$0xff]  }
   0x9   :  { %v3239_v25 = vld [vmem:[%s3830_s1 + $0xac] ss:$16 sps:$4 sm:$0xff]   ;;  %v3244_v26 = vld [vmem:[%s3830_s1 + $0xe4] ss:$16 sps:$4 sm:$0xff]   ;;  %v3249_v27 = vld [vmem:[%s3830_s1 + $0xa8] ss:$16 sps:$4 sm:$0xff]  }
   0xa   :  { %v3255_v28 = vld [vmem:[%s3830_s1 + $0xcc] ss:$16 sps:$4 sm:$0xff]   ;;  %v3262_v29 = vld [vmem:[%s3830_s1 + $0xe0] ss:$16 sps:$4 sm:$0xff]   ;;  %v3268_v30 = vld [vmem:[%s3830_s1 + $0xc8] ss:$16 sps:$4 sm:$0xff]  }
   0xb   :  { %218 = vmatpush1.bf16.msra.mxu0 %v3138_v8  ;;  %259 = vmatpush1.bf16.msra.mxu1 %v3180_v15  ;;  %v3274_v31 = vld [vmem:[%s3830_s1 + $0xec] ss:$16 sps:$4 sm:$0xff]   ;;  %v3284_v32 = vld [vmem:[%s3830_s1 + $0xe8] ss:$16 sps:$4 sm:$0xff]   ;;  %v16_v34 = vld [vmem:[%s3831_s0] sm:$0xff] }
   0xc   :  { %219 = vmatprep.subr.bf16.mxu0 %v3145_v9  ;;  %260 = vmatprep.subr.bf16.mxu1 %v3186_v16  ;;  %v17_v35 = vld [vmem:[%s3831_s0 + $0x8] sm:$0xff]  ;;  %v19_v44 = vld [vmem:[%s3831_s0 + $0x18] sm:$0xff]  ;;  %v18_v50 = vld [vmem:[%s3831_s0 + $0x10] sm:$0xff] }
   0xf   :  { %220 = vmatpush1.bf16.msra.mxu0 %v3163_v12  ;;  %261 = vmatpush1.bf16.msra.mxu1 %v3204_v19 }
  0x10   :  { %221 = vmatprep.subr.bf16.mxu0 %v3168_v13  ;;  %262 = vmatprep.subr.bf16.mxu1 %v3210_v20 }
  0x13   :  { %222 = vmatpush1.bf16.msra.mxu0 %v3192_v17  ;;  %263 = vmatpush1.bf16.msra.mxu1 %v3228_v23 }
  0x14   :  { %223 = vmatprep.subr.bf16.mxu0 %v3198_v18  ;;  %264 = vmatprep.subr.bf16.mxu1 %v3239_v25 }
  0x17   :  { %224 = vmatpush1.bf16.msra.mxu0 %v3216_v21  ;;  %265 = vmatpush1.bf16.msra.mxu1 %v3249_v27 }
  0x18   :  { %225 = vmatprep.subr.bf16.mxu0 %v3221_v22  ;;  %266 = vmatprep.subr.bf16.mxu1 %v3255_v28 }
  0x1b   :  { %226 = vmatpush1.bf16.msra.mxu0 %v3233_v24  ;;  %267 = vmatpush1.bf16.msra.mxu1 %v3268_v30 }
  0x1c   :  { %227 = vmatprep.subr.bf16.mxu0 %v3244_v26  ;;  %268 = vmatprep.subr.bf16.mxu1 %v3274_v31 }
  0x1f   :  { %228 = vmatpush1.bf16.msra.mxu0 %v3262_v29  ;;  %269 = vmatpush1.bf16.msra.mxu1 %v3284_v32 }
  0x20   :  { %527 = vmatprep.subr.bf16.mxu0 %v3097_v0  ;;  %568 = vmatprep.subr.bf16.mxu1 %v3127_v6 }
  0x22   :  { %246 = vmatmul.mubr.bf16.vlgmr.msra.gmra.mrb[0].mxu0 %v3078_v33  ;;  %287 = vmatmul.mubr.bf16.vlgmr.msra.gmra.mrb[0].mxu1 %v3078_v33 }
  0x23   :  { %528 = vmatpush1.bf16.msra.mxu0 %v3104_v2  ;;  %559 = vmatprep.mubr.bf16.mxu0 %v3077_v1 }
  0x24   :  { %529 = vmatprep.subr.bf16.mxu0 %v3110_v3  ;;  %569 = vmatpush1.bf16.msra.mxu1 %v3132_v7 }
  0x25   :  { %570 = vmatprep.subr.bf16.mxu1 %v3151_v10  ;;  %600 = vmatprep.mubr.bf16.mxu1 %v3077_v1 }
  0x27   :  { %530 = vmatpush1.bf16.msra.mxu0 %v3116_v4 }
  0x28   :  { %531 = vmatprep.subr.bf16.mxu0 %v3122_v5  ;;  %571 = vmatpush1.bf16.msra.mxu1 %v3156_v11 }
  0x29   :  { %572 = vmatprep.subr.bf16.mxu1 %v3173_v14 }
  0x2b   :  { %532 = vmatpush1.bf16.msra.mxu0 %v3138_v8 }
  0x2c   :  { %533 = vmatprep.subr.bf16.mxu0 %v3145_v9  ;;  %573 = vmatpush1.bf16.msra.mxu1 %v3180_v15 }
  0x2d   :  { %574 = vmatprep.subr.bf16.mxu1 %v3186_v16 }
  0x2f   :  { %534 = vmatpush1.bf16.msra.mxu0 %v3163_v12 }
  0x30   :  { %535 = vmatprep.subr.bf16.mxu0 %v3168_v13  ;;  %575 = vmatpush1.bf16.msra.mxu1 %v3204_v19 }
  0x31   :  { %576 = vmatprep.subr.bf16.mxu1 %v3210_v20 }
  0x33   :  { %536 = vmatpush1.bf16.msra.mxu0 %v3192_v17 }
  0x34   :  { %537 = vmatprep.subr.bf16.mxu0 %v3198_v18  ;;  %577 = vmatpush1.bf16.msra.mxu1 %v3228_v23 }
  0x35   :  { %578 = vmatprep.subr.bf16.mxu1 %v3239_v25 }
  0x37   :  { %538 = vmatpush1.bf16.msra.mxu0 %v3216_v21 }
  0x38   :  { %539 = vmatprep.subr.bf16.mxu0 %v3221_v22  ;;  %579 = vmatpush1.bf16.msra.mxu1 %v3249_v27 }
  0x39   :  { %580 = vmatprep.subr.bf16.mxu1 %v3255_v28 }
  0x3b   :  { %540 = vmatpush1.bf16.msra.mxu0 %v3233_v24 }
  0x3c   :  { %541 = vmatprep.subr.bf16.mxu0 %v3244_v26  ;;  %581 = vmatpush1.bf16.msra.mxu1 %v3268_v30 }
  0x3d   :  { %582 = vmatprep.subr.bf16.mxu1 %v3274_v31 }
  0x3f   :  { %542 = vmatpush1.bf16.msra.mxu0 %v3262_v29 }
  0x40   :  { %842 = vmatprep.subr.bf16.mxu0 %v3097_v0  ;;  %583 = vmatpush1.bf16.msra.mxu1 %v3284_v32 }
  0x41   :  { %883 = vmatprep.subr.bf16.mxu1 %v3127_v6 }
  0xf5   :  { %v247_v36 = vpop.f32.mrb[0].mxu0  ;;  %v288_v45 = vpop.f32.mrb[0].mxu1 }
  0xf6   :  { %v295_v37 = vadd.f32 %v247_v36, %v16_v34  ;;  %v249_v38 = vpop.f32.mrb[1].mxu0  ;;  %v290_v46 = vpop.f32.mrb[1].mxu1  ;;  %v297_v52 = vadd.f32 %v288_v45, %v18_v50  ;;  %v2574_v50 = vld [vmem:[%s3831_s0 + $0x38] sm:$0xff] }
  0xf7   :  { %v296_v39 = vadd.f32 %v249_v38, %v17_v35  ;;  %v251_v40 = vpop.f32.mrb[2].mxu0  ;;  %v298_v47 = vadd.f32 %v290_v46, %v19_v44  ;;  %v292_v48 = vpop.f32.mrb[2].mxu1  ;;  %v2571_v38 = vld [vmem:[%s3831_s0 + $0x20] sm:$0xff] }
  0xf8   :  { %v2568_v41 = vmul.f32 -1.442695, %v295_v37  ;;  %v252_v42 = vpop.f32.mrb[3].mxu0  ;;  %v293_v49 = vpop.f32.mrb[3].mxu1 }
  0xf9   :  { %v2569_v43 = vmul.f32 -1.442695, %v296_v39  ;;  %v2570_v51 = vmul.f32 -1.442695, %v298_v47  ;;  %v2572_v39 = vld [vmem:[%s3831_s0 + $0x28] sm:$0xff] }
  0xfa   :  { %2949 = vpow2.f32 %v2568_v41 }
  0xfb   :  { %2951 = vpow2.f32 %v2569_v43 }
  0xfc   :  { %2953 = vpow2.f32 %v2570_v51 }
  0xfd   :  { %2955 = vtanh.f32 %v297_v52  ;;  %v2573_v52 = vld [vmem:[%s3831_s0 + $0x30] sm:$0xff] }
 0x104   :  { %v2950_v53 = vpop.eup %2949 }
 0x105   :  { %v2952_v54 = vpop.eup %2951  ;;  %v302_v55 = vadd.f32 1.0, %v2950_v53 }
 0x106   :  { %v308_v56 = vadd.f32 1.0, %v2952_v54  ;;  %v2954_v57 = vpop.eup %2953 }
 0x107   :  { %2957 = vrcp.f32 %v302_v55  ;;  %v2956_v58 = vpop.eup %2955  ;;  %v315_v60 = vadd.f32 1.0, %v2954_v57 }
 0x108   :  { %2959 = vrcp.f32 %v308_v56 }
 0x109   :  { %2961 = vrcp.f32 %v315_v60 }
 0x111   :  { %v2958_v59 = vpop.eup %2957 }
 0x112   :  { %v2960_v61 = vpop.eup %2959  ;;  %v319_v62 = vmul.f32 %v2958_v59, %v2956_v58 }
 0x113   :  { %v318_v63 = vmul.f32 0.0, %v2960_v61  ;;  %v2962_v34 = vpop.eup %2961 }
 0x115   :  { %v3336_v33 = vadd.f32 %v319_v62, %v318_v63 }
 0x117   :  { %2963 = vtanh.f32 %v3336_v33 }
 0x121   :  { %v2964_v35 = vpop.eup %2963 }
 0x122   :  { %v322_v36 = vmul.f32 %v2964_v35, %v2962_v34 }
 0x124   :  { %v325_v37 = vpack.c.bf16 %v322_v36, %v322_v36 }
 0x126   :  { %326 = vst [vmem:[%s3832_s2] sm:$0xf] %v325_v37  ;;  %560 = vmatmul.mubr.bf16.vlgmr.msra.gmra.mrb[4].mxu0 %v325_v37  ;;  %601 = vmatmul.mubr.bf16.vlgmr.msra.gmra.mrb[4].mxu1 %v325_v37 }
 0x127   :  { %843 = vmatpush1.bf16.msra.mxu0 %v3104_v2  ;;  %884 = vmatpush1.bf16.msra.mxu1 %v3132_v7 }
 0x128   :  { %844 = vmatprep.subr.bf16.mxu0 %v3110_v3  ;;  %885 = vmatprep.subr.bf16.mxu1 %v3151_v10 }
 0x129   :  { %874 = vmatprep.mubr.bf16.mxu0 %v3077_v1  ;;  %915 = vmatprep.mubr.bf16.mxu1 %v3077_v1 }
 0x12b   :  { %845 = vmatpush1.bf16.msra.mxu0 %v3116_v4  ;;  %886 = vmatpush1.bf16.msra.mxu1 %v3156_v11 }
 0x12c   :  { %846 = vmatprep.subr.bf16.mxu0 %v3122_v5  ;;  %887 = vmatprep.subr.bf16.mxu1 %v3173_v14 }
 0x12f   :  { %847 = vmatpush1.bf16.msra.mxu0 %v3138_v8  ;;  %888 = vmatpush1.bf16.msra.mxu1 %v3180_v15 }
 0x130   :  { %848 = vmatprep.subr.bf16.mxu0 %v3145_v9  ;;  %889 = vmatprep.subr.bf16.mxu1 %v3186_v16 }
 0x133   :  { %849 = vmatpush1.bf16.msra.mxu0 %v3163_v12  ;;  %890 = vmatpush1.bf16.msra.mxu1 %v3204_v19 }
 0x134   :  { %850 = vmatprep.subr.bf16.mxu0 %v3168_v13  ;;  %891 = vmatprep.subr.bf16.mxu1 %v3210_v20 }
 0x137   :  { %851 = vmatpush1.bf16.msra.mxu0 %v3192_v17  ;;  %892 = vmatpush1.bf16.msra.mxu1 %v3228_v23 }
 0x138   :  { %852 = vmatprep.subr.bf16.mxu0 %v3198_v18  ;;  %893 = vmatprep.subr.bf16.mxu1 %v3239_v25 }
 0x13b   :  { %853 = vmatpush1.bf16.msra.mxu0 %v3216_v21  ;;  %894 = vmatpush1.bf16.msra.mxu1 %v3249_v27 }
 0x13c   :  { %854 = vmatprep.subr.bf16.mxu0 %v3221_v22  ;;  %895 = vmatprep.subr.bf16.mxu1 %v3255_v28 }
 0x13f   :  { %855 = vmatpush1.bf16.msra.mxu0 %v3233_v24  ;;  %896 = vmatpush1.bf16.msra.mxu1 %v3268_v30 }
 0x140   :  { %856 = vmatprep.subr.bf16.mxu0 %v3244_v26  ;;  %897 = vmatprep.subr.bf16.mxu1 %v3274_v31 }
 0x143   :  { %857 = vmatpush1.bf16.msra.mxu0 %v3262_v29  ;;  %898 = vmatpush1.bf16.msra.mxu1 %v3284_v32 }
 0x144   :  { %1157 = vmatprep.subr.bf16.mxu0 %v3097_v0  ;;  %1198 = vmatprep.subr.bf16.mxu1 %v3127_v6 }
 0x1f9   :  { %v561_v40 = vpop.f32.mrb[4].mxu0  ;;  %v602_v41 = vpop.f32.mrb[4].mxu1 }
 0x1fa   :  { %v609_v42 = vadd.f32 %v2571_v38, %v561_v40  ;;  %v563_v43 = vpop.f32.mrb[5].mxu0  ;;  %v604_v44 = vpop.f32.mrb[5].mxu1  ;;  %v611_v54 = vadd.f32 %v2573_v52, %v602_v41  ;;  %v3504_v52 = vld [vmem:[%s3830_s1 + $0x4c] ss:$16 sps:$4 sm:$0xff]  }
 0x1fb   :  { %v610_v45 = vadd.f32 %v2572_v39, %v563_v43  ;;  %v565_v46 = vpop.f32.mrb[6].mxu0  ;;  %v606_v47 = vpop.f32.mrb[6].mxu1  ;;  %v612_v51 = vadd.f32 %v2574_v50, %v604_v44  ;;  %v3490_v50 = vld [vmem:[%s3830_s1 + $0x28] ss:$16 sps:$4 sm:$0xff]  }
 0x1fc   :  { %v2607_v48 = vmul.f32 -1.442695, %v609_v42  ;;  %v566_v0 = vpop.f32.mrb[7].mxu0  ;;  %v607_v49 = vpop.f32.mrb[7].mxu1  ;;  %v3456_v46 = vld [vmem:[%s3830_s1 + $0xc] ss:$16 sps:$4 sm:$0xff]  }
 0x1fd   :  { %v2608_v6 = vmul.f32 -1.442695, %v610_v45  ;;  %v2609_v53 = vmul.f32 -1.442695, %v612_v51  ;;  %v3451_v45 = vld [vmem:[%s3830_s1 + $0x4] ss:$16 sps:$4 sm:$0xff]  }
 0x1fe   :  { %2965 = vpow2.f32 %v2607_v48  ;;  %v3461_v47 = vld [vmem:[%s3830_s1] ss:$16 sps:$4 sm:$0xff]   ;;  %v3466_v48 = vld [vmem:[%s3830_s1 + $0x8] ss:$16 sps:$4 sm:$0xff]   ;;  %v3475_v0 = vld [vmem:[%s3830_s1 + $0x24] ss:$16 sps:$4 sm:$0xff]  }
 0x1ff   :  { %2967 = vpow2.f32 %v2608_v6  ;;  %v3480_v49 = vld [vmem:[%s3830_s1 + $0x2c] ss:$16 sps:$4 sm:$0xff]   ;;  %v3485_v6 = vld [vmem:[%s3830_s1 + $0x20] ss:$16 sps:$4 sm:$0xff]   ;;  %v3499_v51 = vld [vmem:[%s3830_s1 + $0x44] ss:$16 sps:$4 sm:$0xff]  }
 0x200   :  { %2969 = vpow2.f32 %v2609_v53  ;;  %v3509_v53 = vld [vmem:[%s3830_s1 + $0x40] ss:$16 sps:$4 sm:$0xff]  }
 0x201   :  { %2971 = vtanh.f32 %v611_v54  ;;  %v3514_v54 = vld [vmem:[%s3830_s1 + $0x48] ss:$16 sps:$4 sm:$0xff]  }
 0x208   :  { %v2966_v55 = vpop.eup %2965 }
 0x209   :  { %v2968_v56 = vpop.eup %2967  ;;  %v616_v57 = vadd.f32 1.0, %v2966_v55  ;;  %v3523_v55 = vld [vmem:[%s3830_s1 + $0x64] ss:$16 sps:$4 sm:$0xff]  }
 0x20a   :  { %v622_v58 = vadd.f32 1.0, %v2968_v56  ;;  %v2970_v59 = vpop.eup %2969  ;;  %v3528_v56 = vld [vmem:[%s3830_s1 + $0x6c] ss:$16 sps:$4 sm:$0xff]  }
 0x20b   :  { %2973 = vrcp.f32 %v616_v57  ;;  %v2972_v60 = vpop.eup %2971  ;;  %v629_v34 = vadd.f32 1.0, %v2970_v59  ;;  %v3533_v57 = vld [vmem:[%s3830_s1 + $0x60] ss:$16 sps:$4 sm:$0xff]  }
 0x20c   :  { %2975 = vrcp.f32 %v622_v58  ;;  %v3538_v58 = vld [vmem:[%s3830_s1 + $0x68] ss:$16 sps:$4 sm:$0xff]   ;;  %v3547_v59 = vld [vmem:[%s3830_s1 + $0x80] ss:$16 sps:$4 sm:$0xff]  }
 0x20d   :  { %2977 = vrcp.f32 %v629_v34  ;;  %v3573_v34 = vld [vmem:[%s3830_s1 + $0xac] ss:$16 sps:$4 sm:$0xff]  }
 0x215   :  { %v2974_v61 = vpop.eup %2973 }
 0x216   :  { %v2976_v62 = vpop.eup %2975  ;;  %v633_v63 = vmul.f32 %v2974_v61, %v2972_v60  ;;  %v3552_v60 = vld [vmem:[%s3830_s1 + $0x84] ss:$16 sps:$4 sm:$0xff]   ;;  %v3557_v61 = vld [vmem:[%s3830_s1 + $0x88] ss:$16 sps:$4 sm:$0xff]  }
 0x217   :  { %v632_v35 = vmul.f32 %v2976_v62, %v3336_v33  ;;  %v2978_v37 = vpop.eup %2977  ;;  %v3562_v62 = vld [vmem:[%s3830_s1 + $0x8c] ss:$16 sps:$4 sm:$0xff]  }
 0x219   :  { %v3389_v36 = vadd.f32 %v633_v63, %v632_v35  ;;  %v3567_v63 = vld [vmem:[%s3830_s1 + $0xa4] ss:$16 sps:$4 sm:$0xff]   ;;  %v3580_v35 = vld [vmem:[%s3830_s1 + $0xa0] ss:$16 sps:$4 sm:$0xff]  }
 0x21b   :  { %2979 = vtanh.f32 %v3389_v36 }
 0x225   :  { %v2980_v38 = vpop.eup %2979 }
 0x226   :  { %v636_v39 = vmul.f32 %v2980_v38, %v2978_v37  ;;  %v3592_v37 = vld [vmem:[%s3830_s1 + $0xc4] ss:$16 sps:$4 sm:$0xff]   ;;  %v3598_v38 = vld [vmem:[%s3830_s1 + $0xcc] ss:$16 sps:$4 sm:$0xff]  }
 0x228   :  { %v639_v40 = vpack.c.bf16 %v636_v39, %v636_v39  ;;  %v3604_v39 = vld [vmem:[%s3830_s1 + $0xc0] ss:$16 sps:$4 sm:$0xff]  }
 0x22a   :  { %2610 = vst [vmem:[%s3832_s2 + $0x4] sm:$0xf] %v639_v40  ;;  %875 = vmatmul.mubr.bf16.vlgmr.msra.gmra.mrb[8].mxu0 %v639_v40  ;;  %916 = vmatmul.mubr.bf16.vlgmr.msra.gmra.mrb[8].mxu1 %v639_v40  ;;  %v3611_v40 = vld [vmem:[%s3830_s1 + $0xc8] ss:$16 sps:$4 sm:$0xff]  }
 0x22b   :  { %1158 = vmatpush1.bf16.msra.mxu0 %v3104_v2  ;;  %1199 = vmatpush1.bf16.msra.mxu1 %v3132_v7  ;;  %v2611_v2 = vld [vmem:[%s3831_s0 + $0x40] sm:$0xff] }
 0x22c   :  { %1159 = vmatprep.subr.bf16.mxu0 %v3110_v3  ;;  %1200 = vmatprep.subr.bf16.mxu1 %v3151_v10  ;;  %v2612_v3 = vld [vmem:[%s3831_s0 + $0x48] sm:$0xff] }
 0x22d   :  { %1189 = vmatprep.mubr.bf16.mxu0 %v3077_v1  ;;  %1230 = vmatprep.mubr.bf16.mxu1 %v3077_v1 }
 0x22f   :  { %1160 = vmatpush1.bf16.msra.mxu0 %v3116_v4  ;;  %1201 = vmatpush1.bf16.msra.mxu1 %v3156_v11 }
 0x230   :  { %1161 = vmatprep.subr.bf16.mxu0 %v3122_v5  ;;  %1202 = vmatprep.subr.bf16.mxu1 %v3173_v14 }
 0x233   :  { %1162 = vmatpush1.bf16.msra.mxu0 %v3138_v8  ;;  %1203 = vmatpush1.bf16.msra.mxu1 %v3180_v15 }
 0x234   :  { %1163 = vmatprep.subr.bf16.mxu0 %v3145_v9  ;;  %1204 = vmatprep.subr.bf16.mxu1 %v3186_v16 }
 0x237   :  { %1164 = vmatpush1.bf16.msra.mxu0 %v3163_v12  ;;  %1205 = vmatpush1.bf16.msra.mxu1 %v3204_v19  ;;  %v2613_v19 = vld [vmem:[%s3831_s0 + $0x50] sm:$0xff] }
 0x238   :  { %1165 = vmatprep.subr.bf16.mxu0 %v3168_v13  ;;  %1206 = vmatprep.subr.bf16.mxu1 %v3210_v20 }
 0x23b   :  { %1166 = vmatpush1.bf16.msra.mxu0 %v3192_v17  ;;  %1207 = vmatpush1.bf16.msra.mxu1 %v3228_v23  ;;  %v2614_v17 = vld [vmem:[%s3831_s0 + $0x58] sm:$0xff] }
 0x23c   :  { %1167 = vmatprep.subr.bf16.mxu0 %v3198_v18  ;;  %1208 = vmatprep.subr.bf16.mxu1 %v3239_v25 }
 0x23f   :  { %1168 = vmatpush1.bf16.msra.mxu0 %v3216_v21  ;;  %1209 = vmatpush1.bf16.msra.mxu1 %v3249_v27 }
 0x240   :  { %1169 = vmatprep.subr.bf16.mxu0 %v3221_v22  ;;  %1210 = vmatprep.subr.bf16.mxu1 %v3255_v28 }
 0x243   :  { %1170 = vmatpush1.bf16.msra.mxu0 %v3233_v24  ;;  %1211 = vmatpush1.bf16.msra.mxu1 %v3268_v30 }
 0x244   :  { %1171 = vmatprep.subr.bf16.mxu0 %v3244_v26  ;;  %1212 = vmatprep.subr.bf16.mxu1 %v3274_v31 }
 0x247   :  { %1172 = vmatpush1.bf16.msra.mxu0 %v3262_v29  ;;  %1213 = vmatpush1.bf16.msra.mxu1 %v3284_v32 }
 0x248   :  { %1472 = vmatprep.subr.bf16.mxu0 %v3451_v45  ;;  %1513 = vmatprep.subr.bf16.mxu1 %v3456_v46 }
 0x2fd   :  { %v876_v4 = vpop.f32.mrb[8].mxu0  ;;  %v917_v5 = vpop.f32.mrb[8].mxu1 }
 0x2fe   :  { %v924_v7 = vadd.f32 %v2611_v2, %v876_v4  ;;  %v878_v8 = vpop.f32.mrb[9].mxu0  ;;  %v919_v9 = vpop.f32.mrb[9].mxu1  ;;  %v926_v21 = vadd.f32 %v2613_v19, %v917_v5  ;;  %v3616_v2 = vld [vmem:[%s3830_s1 + $0xe4] ss:$16 sps:$4 sm:$0xff]   ;;  %v3628_v4 = vld [vmem:[%s3830_s1 + $0xe0] ss:$16 sps:$4 sm:$0xff]  }
 0x2ff   :  { %v925_v10 = vadd.f32 %v2612_v3, %v878_v8  ;;  %v880_v11 = vpop.f32.mrb[10].mxu0  ;;  %v921_v12 = vpop.f32.mrb[10].mxu1  ;;  %v927_v18 = vadd.f32 %v2614_v17, %v919_v9  ;;  %v3622_v3 = vld [vmem:[%s3830_s1 + $0xec] ss:$16 sps:$4 sm:$0xff]   ;;  %v3635_v5 = vld [vmem:[%s3830_s1 + $0xe8] ss:$16 sps:$4 sm:$0xff]  }
 0x300   :  { %v2647_v13 = vmul.f32 -1.442695, %v924_v7  ;;  %v881_v14 = vpop.f32.mrb[11].mxu0  ;;  %v922_v15 = vpop.f32.mrb[11].mxu1  ;;  %v2651_v7 = vld [vmem:[%s3831_s0 + $0x60] sm:$0xff]  ;;  %v2652_v8 = vld [vmem:[%s3831_s0 + $0x68] sm:$0xff] }
 0x301   :  { %v2648_v16 = vmul.f32 -1.442695, %v925_v10  ;;  %v2649_v20 = vmul.f32 -1.442695, %v927_v18 }
 0x302   :  { %2981 = vpow2.f32 %v2647_v13 }
 0x303   :  { %2983 = vpow2.f32 %v2648_v16 }
 0x304   :  { %2985 = vpow2.f32 %v2649_v20 }
 0x305   :  { %2987 = vtanh.f32 %v926_v21  ;;  %v2654_v21 = vld [vmem:[%s3831_s0 + $0x78] sm:$0xff] }
 0x30c   :  { %v2982_v22 = vpop.eup %2981 }
 0x30d   :  { %v2984_v23 = vpop.eup %2983  ;;  %v931_v24 = vadd.f32 1.0, %v2982_v22 }
 0x30e   :  { %v937_v25 = vadd.f32 1.0, %v2984_v23  ;;  %v2986_v26 = vpop.eup %2985  ;;  %v2653_v23 = vld [vmem:[%s3831_s0 + $0x70] sm:$0xff] }
 0x30f   :  { %2989 = vrcp.f32 %v931_v24  ;;  %v2988_v27 = vpop.eup %2987  ;;  %v944_v31 = vadd.f32 1.0, %v2986_v26 }
 0x310   :  { %2991 = vrcp.f32 %v937_v25 }
 0x311   :  { %2993 = vrcp.f32 %v944_v31 }
 0x319   :  { %v2990_v28 = vpop.eup %2989 }
 0x31a   :  { %v2992_v29 = vpop.eup %2991  ;;  %v948_v30 = vmul.f32 %v2990_v28, %v2988_v27 }
 0x31b   :  { %v947_v32 = vmul.f32 %v2992_v29, %v3389_v36  ;;  %v2994_v41 = vpop.eup %2993  ;;  %v3587_v36 = vld [vmem:[%s3830_s1 + $0xa8] ss:$16 sps:$4 sm:$0xff]  }
 0x31d   :  { %v3440_v33 = vadd.f32 %v948_v30, %v947_v32 }
 0x31f   :  { %2995 = vtanh.f32 %v3440_v33 }
 0x329   :  { %v2996_v42 = vpop.eup %2995 }
 0x32a   :  { %v951_v43 = vmul.f32 %v2996_v42, %v2994_v41 }
 0x32c   :  { %v954_v44 = vpack.c.bf16 %v951_v43, %v951_v43 }
 0x32e   :  { %2650 = vst [vmem:[%s3832_s2 + $0x8] sm:$0xf] %v954_v44  ;;  %1190 = vmatmul.mubr.bf16.vlgmr.msra.gmra.mrb[12].mxu0 %v954_v44  ;;  %1231 = vmatmul.mubr.bf16.vlgmr.msra.gmra.mrb[12].mxu1 %v954_v44 }
 0x32f   :  { %1504 = vmatprep.mubr.bf16.mxu0 %v3077_v1  ;;  %1545 = vmatprep.mubr.bf16.mxu1 %v3077_v1 }
 0x330   :  { %1473 = vmatpush1.bf16.msra.mxu0 %v3461_v47  ;;  %1514 = vmatpush1.bf16.msra.mxu1 %v3466_v48 }
 0x331   :  { %1474 = vmatprep.subr.bf16.mxu0 %v3475_v0  ;;  %1515 = vmatprep.subr.bf16.mxu1 %v3480_v49 }
 0x334   :  { %1475 = vmatpush1.bf16.msra.mxu0 %v3485_v6  ;;  %1516 = vmatpush1.bf16.msra.mxu1 %v3490_v50 }
 0x335   :  { %1476 = vmatprep.subr.bf16.mxu0 %v3499_v51  ;;  %1517 = vmatprep.subr.bf16.mxu1 %v3504_v52 }
 0x338   :  { %1477 = vmatpush1.bf16.msra.mxu0 %v3509_v53  ;;  %1518 = vmatpush1.bf16.msra.mxu1 %v3514_v54 }
 0x339   :  { %1478 = vmatprep.subr.bf16.mxu0 %v3523_v55  ;;  %1519 = vmatprep.subr.bf16.mxu1 %v3528_v56 }
 0x33c   :  { %1479 = vmatpush1.bf16.msra.mxu0 %v3533_v57  ;;  %1520 = vmatpush1.bf16.msra.mxu1 %v3538_v58 }
 0x33d   :  { %1480 = vmatprep.subr.bf16.mxu0 %v3552_v60  ;;  %1521 = vmatprep.subr.bf16.mxu1 %v3562_v62 }
 0x340   :  { %1481 = vmatpush1.bf16.msra.mxu0 %v3547_v59  ;;  %1522 = vmatpush1.bf16.msra.mxu1 %v3557_v61 }
 0x341   :  { %1482 = vmatprep.subr.bf16.mxu0 %v3567_v63  ;;  %1523 = vmatprep.subr.bf16.mxu1 %v3573_v34 }
 0x344   :  { %1483 = vmatpush1.bf16.msra.mxu0 %v3580_v35  ;;  %1524 = vmatpush1.bf16.msra.mxu1 %v3587_v36 }
 0x345   :  { %1484 = vmatprep.subr.bf16.mxu0 %v3592_v37  ;;  %1525 = vmatprep.subr.bf16.mxu1 %v3598_v38 }
 0x348   :  { %1485 = vmatpush1.bf16.msra.mxu0 %v3604_v39  ;;  %1526 = vmatpush1.bf16.msra.mxu1 %v3611_v40 }
 0x349   :  { %1486 = vmatprep.subr.bf16.mxu0 %v3616_v2  ;;  %1527 = vmatprep.subr.bf16.mxu1 %v3622_v3 }
 0x34c   :  { %1487 = vmatpush1.bf16.msra.mxu0 %v3628_v4  ;;  %1528 = vmatpush1.bf16.msra.mxu1 %v3635_v5 }
 0x34d   :  { %1787 = vmatprep.subr.bf16.mxu0 %v3451_v45  ;;  %1828 = vmatprep.subr.bf16.mxu1 %v3456_v46 }
 0x401   :  { %v1191_v9 = vpop.f32.mrb[12].mxu0  ;;  %v1232_v10 = vpop.f32.mrb[12].mxu1 }
 0x402   :  { %v1239_v11 = vadd.f32 %v2651_v7, %v1191_v9  ;;  %v1193_v12 = vpop.f32.mrb[13].mxu0  ;;  %v1234_v13 = vpop.f32.mrb[13].mxu1  ;;  %v1241_v25 = vadd.f32 %v2653_v23, %v1232_v10 }
 0x403   :  { %v1240_v14 = vadd.f32 %v2652_v8, %v1193_v12  ;;  %v1195_v15 = vpop.f32.mrb[14].mxu0  ;;  %v1236_v16 = vpop.f32.mrb[14].mxu1  ;;  %v1242_v22 = vadd.f32 %v2654_v21, %v1234_v13  ;;  %v2692_v12 = vld [vmem:[%s3831_s0 + $0x88] sm:$0xff] }
 0x404   :  { %v2687_v17 = vmul.f32 -1.442695, %v1239_v11  ;;  %v1196_v18 = vpop.f32.mrb[15].mxu0  ;;  %v1237_v19 = vpop.f32.mrb[15].mxu1 }
 0x405   :  { %v2688_v20 = vmul.f32 -1.442695, %v1240_v14  ;;  %v2689_v24 = vmul.f32 -1.442695, %v1242_v22 }
 0x406   :  { %2997 = vpow2.f32 %v2687_v17 }
 0x407   :  { %2999 = vpow2.f32 %v2688_v20 }
 0x408   :  { %3001 = vpow2.f32 %v2689_v24 }
 0x409   :  { %3003 = vtanh.f32 %v1241_v25  ;;  %v2694_v25 = vld [vmem:[%s3831_s0 + $0x98] sm:$0xff] }
 0x410   :  { %v2998_v26 = vpop.eup %2997 }
 0x411   :  { %v3000_v27 = vpop.eup %2999  ;;  %v1246_v28 = vadd.f32 1.0, %v2998_v26 }
 0x412   :  { %v1252_v29 = vadd.f32 1.0, %v3000_v27  ;;  %v3002_v30 = vpop.eup %3001  ;;  %v2693_v27 = vld [vmem:[%s3831_s0 + $0x90] sm:$0xff] }
 0x413   :  { %3005 = vrcp.f32 %v1246_v28  ;;  %v3004_v31 = vpop.eup %3003  ;;  %v1259_v43 = vadd.f32 1.0, %v3002_v30 }
 0x414   :  { %3007 = vrcp.f32 %v1252_v29 }
 0x415   :  { %3009 = vrcp.f32 %v1259_v43 }
 0x41d   :  { %v3006_v32 = vpop.eup %3005 }
 0x41e   :  { %v3008_v41 = vpop.eup %3007  ;;  %v1263_v42 = vmul.f32 %v3006_v32, %v3004_v31 }
 0x41f   :  { %v1262_v44 = vmul.f32 %v3008_v41, %v3440_v33  ;;  %v3010_v8 = vpop.eup %3009  ;;  %v2691_v33 = vld [vmem:[%s3831_s0 + $0x80] sm:$0xff] }
 0x421   :  { %v3655_v7 = vadd.f32 %v1263_v42, %v1262_v44 }
 0x423   :  { %3011 = vtanh.f32 %v3655_v7 }
 0x42d   :  { %v3012_v9 = vpop.eup %3011 }
 0x42e   :  { %v1266_v10 = vmul.f32 %v3012_v9, %v3010_v8 }
 0x430   :  { %v1269_v11 = vpack.c.bf16 %v1266_v10, %v1266_v10 }
 0x432   :  { %2690 = vst [vmem:[%s3832_s2 + $0xc] sm:$0xf] %v1269_v11  ;;  %1505 = vmatmul.mubr.bf16.vlgmr.msra.gmra.mrb[16].mxu0 %v1269_v11  ;;  %1546 = vmatmul.mubr.bf16.vlgmr.msra.gmra.mrb[16].mxu1 %v1269_v11 }
 0x433   :  { %1788 = vmatpush1.bf16.msra.mxu0 %v3461_v47  ;;  %1829 = vmatpush1.bf16.msra.mxu1 %v3466_v48 }
 0x434   :  { %1789 = vmatprep.subr.bf16.mxu0 %v3475_v0  ;;  %1830 = vmatprep.subr.bf16.mxu1 %v3480_v49 }
 0x435   :  { %1819 = vmatprep.mubr.bf16.mxu0 %v3077_v1  ;;  %1860 = vmatprep.mubr.bf16.mxu1 %v3077_v1 }
 0x437   :  { %1790 = vmatpush1.bf16.msra.mxu0 %v3485_v6  ;;  %1831 = vmatpush1.bf16.msra.mxu1 %v3490_v50 }
 0x438   :  { %1791 = vmatprep.subr.bf16.mxu0 %v3499_v51  ;;  %1832 = vmatprep.subr.bf16.mxu1 %v3504_v52 }
 0x43b   :  { %1792 = vmatpush1.bf16.msra.mxu0 %v3509_v53  ;;  %1833 = vmatpush1.bf16.msra.mxu1 %v3514_v54 }
 0x43c   :  { %1793 = vmatprep.subr.bf16.mxu0 %v3523_v55  ;;  %1834 = vmatprep.subr.bf16.mxu1 %v3528_v56 }
 0x43f   :  { %1794 = vmatpush1.bf16.msra.mxu0 %v3533_v57  ;;  %1835 = vmatpush1.bf16.msra.mxu1 %v3538_v58 }
 0x440   :  { %1795 = vmatprep.subr.bf16.mxu0 %v3552_v60  ;;  %1836 = vmatprep.subr.bf16.mxu1 %v3562_v62 }
 0x443   :  { %1796 = vmatpush1.bf16.msra.mxu0 %v3547_v59  ;;  %1837 = vmatpush1.bf16.msra.mxu1 %v3557_v61 }
 0x444   :  { %1797 = vmatprep.subr.bf16.mxu0 %v3567_v63  ;;  %1838 = vmatprep.subr.bf16.mxu1 %v3573_v34 }
 0x447   :  { %1798 = vmatpush1.bf16.msra.mxu0 %v3580_v35  ;;  %1839 = vmatpush1.bf16.msra.mxu1 %v3587_v36 }
 0x448   :  { %1799 = vmatprep.subr.bf16.mxu0 %v3592_v37  ;;  %1840 = vmatprep.subr.bf16.mxu1 %v3598_v38 }
 0x44b   :  { %1800 = vmatpush1.bf16.msra.mxu0 %v3604_v39  ;;  %1841 = vmatpush1.bf16.msra.mxu1 %v3611_v40 }
 0x44c   :  { %1801 = vmatprep.subr.bf16.mxu0 %v3616_v2  ;;  %1842 = vmatprep.subr.bf16.mxu1 %v3622_v3 }
 0x44f   :  { %1802 = vmatpush1.bf16.msra.mxu0 %v3628_v4  ;;  %1843 = vmatpush1.bf16.msra.mxu1 %v3635_v5 }
 0x450   :  { %2102 = vmatprep.subr.bf16.mxu0 %v3451_v45  ;;  %2143 = vmatprep.subr.bf16.mxu1 %v3456_v46 }
 0x505   :  { %v1506_v13 = vpop.f32.mrb[16].mxu0  ;;  %v1547_v14 = vpop.f32.mrb[16].mxu1 }
 0x506   :  { %v1554_v15 = vadd.f32 %v2691_v33, %v1506_v13  ;;  %v1508_v16 = vpop.f32.mrb[17].mxu0  ;;  %v1549_v17 = vpop.f32.mrb[17].mxu1  ;;  %v1556_v29 = vadd.f32 %v2693_v27, %v1547_v14  ;;  %v2734_v27 = vld [vmem:[%s3831_s0 + $0xb8] sm:$0xff] }
 0x507   :  { %v1555_v18 = vadd.f32 %v2692_v12, %v1508_v16  ;;  %v1510_v19 = vpop.f32.mrb[18].mxu0  ;;  %v1551_v20 = vpop.f32.mrb[18].mxu1  ;;  %v1557_v26 = vadd.f32 %v2694_v25, %v1549_v17  ;;  %v2732_v16 = vld [vmem:[%s3831_s0 + $0xa8] sm:$0xff] }
 0x508   :  { %v2727_v21 = vmul.f32 -1.442695, %v1554_v15  ;;  %v1511_v22 = vpop.f32.mrb[19].mxu0  ;;  %v1552_v23 = vpop.f32.mrb[19].mxu1 }
 0x509   :  { %v2728_v24 = vmul.f32 -1.442695, %v1555_v18  ;;  %v2729_v28 = vmul.f32 -1.442695, %v1557_v26 }
 0x50a   :  { %3013 = vpow2.f32 %v2727_v21 }
 0x50b   :  { %3015 = vpow2.f32 %v2728_v24 }
 0x50c   :  { %3017 = vpow2.f32 %v2729_v28 }
 0x50d   :  { %3019 = vtanh.f32 %v1556_v29  ;;  %v2733_v29 = vld [vmem:[%s3831_s0 + $0xb0] sm:$0xff] }
 0x514   :  { %v3014_v30 = vpop.eup %3013 }
 0x515   :  { %v3016_v31 = vpop.eup %3015  ;;  %v1561_v32 = vadd.f32 1.0, %v3014_v30 }
 0x516   :  { %v1567_v41 = vadd.f32 1.0, %v3016_v31  ;;  %v3018_v42 = vpop.eup %3017 }
 0x517   :  { %3021 = vrcp.f32 %v1561_v32  ;;  %v3020_v43 = vpop.eup %3019  ;;  %v1574_v10 = vadd.f32 1.0, %v3018_v42 }
 0x518   :  { %3023 = vrcp.f32 %v1567_v41 }
 0x519   :  { %3025 = vrcp.f32 %v1574_v10 }
 0x521   :  { %v3022_v44 = vpop.eup %3021 }
 0x522   :  { %v3024_v8 = vpop.eup %3023  ;;  %v1578_v9 = vmul.f32 %v3022_v44, %v3020_v43 }
 0x523   :  { %v1577_v11 = vmul.f32 %v3024_v8, %v3655_v7  ;;  %v3026_v12 = vpop.eup %3025  ;;  %v2731_v7 = vld [vmem:[%s3831_s0 + $0xa0] sm:$0xff] }
 0x525   :  { %v3708_v33 = vadd.f32 %v1578_v9, %v1577_v11 }
 0x527   :  { %3027 = vtanh.f32 %v3708_v33 }
 0x531   :  { %v3028_v13 = vpop.eup %3027 }
 0x532   :  { %v1581_v14 = vmul.f32 %v3028_v13, %v3026_v12 }
 0x534   :  { %v1584_v15 = vpack.c.bf16 %v1581_v14, %v1581_v14 }
 0x536   :  { %2730 = vst [vmem:[%s3832_s2 + $0x10] sm:$0xf] %v1584_v15  ;;  %1820 = vmatmul.mubr.bf16.vlgmr.msra.gmra.mrb[20].mxu0 %v1584_v15  ;;  %1861 = vmatmul.mubr.bf16.vlgmr.msra.gmra.mrb[20].mxu1 %v1584_v15 }
 0x537   :  { %2103 = vmatpush1.bf16.msra.mxu0 %v3461_v47  ;;  %2144 = vmatpush1.bf16.msra.mxu1 %v3466_v48 }
 0x538   :  { %2104 = vmatprep.subr.bf16.mxu0 %v3475_v0  ;;  %2145 = vmatprep.subr.bf16.mxu1 %v3480_v49 }
 0x539   :  { %2134 = vmatprep.mubr.bf16.mxu0 %v3077_v1  ;;  %2175 = vmatprep.mubr.bf16.mxu1 %v3077_v1 }
 0x53b   :  { %2105 = vmatpush1.bf16.msra.mxu0 %v3485_v6  ;;  %2146 = vmatpush1.bf16.msra.mxu1 %v3490_v50 }
 0x53c   :  { %2106 = vmatprep.subr.bf16.mxu0 %v3499_v51  ;;  %2147 = vmatprep.subr.bf16.mxu1 %v3504_v52 }
 0x53f   :  { %2107 = vmatpush1.bf16.msra.mxu0 %v3509_v53  ;;  %2148 = vmatpush1.bf16.msra.mxu1 %v3514_v54 }
 0x540   :  { %2108 = vmatprep.subr.bf16.mxu0 %v3523_v55  ;;  %2149 = vmatprep.subr.bf16.mxu1 %v3528_v56 }
 0x543   :  { %2109 = vmatpush1.bf16.msra.mxu0 %v3533_v57  ;;  %2150 = vmatpush1.bf16.msra.mxu1 %v3538_v58 }
 0x544   :  { %2110 = vmatprep.subr.bf16.mxu0 %v3552_v60  ;;  %2151 = vmatprep.subr.bf16.mxu1 %v3562_v62 }
 0x547   :  { %2111 = vmatpush1.bf16.msra.mxu0 %v3547_v59  ;;  %2152 = vmatpush1.bf16.msra.mxu1 %v3557_v61 }
 0x548   :  { %2112 = vmatprep.subr.bf16.mxu0 %v3567_v63  ;;  %2153 = vmatprep.subr.bf16.mxu1 %v3573_v34 }
 0x54b   :  { %2113 = vmatpush1.bf16.msra.mxu0 %v3580_v35  ;;  %2154 = vmatpush1.bf16.msra.mxu1 %v3587_v36 }
 0x54c   :  { %2114 = vmatprep.subr.bf16.mxu0 %v3592_v37  ;;  %2155 = vmatprep.subr.bf16.mxu1 %v3598_v38 }
 0x54f   :  { %2115 = vmatpush1.bf16.msra.mxu0 %v3604_v39  ;;  %2156 = vmatpush1.bf16.msra.mxu1 %v3611_v40 }
 0x550   :  { %2116 = vmatprep.subr.bf16.mxu0 %v3616_v2  ;;  %2157 = vmatprep.subr.bf16.mxu1 %v3622_v3 }
 0x553   :  { %2117 = vmatpush1.bf16.msra.mxu0 %v3628_v4  ;;  %2158 = vmatpush1.bf16.msra.mxu1 %v3635_v5 }
 0x554   :  { %2417 = vmatprep.subr.bf16.mxu0 %v3451_v45  ;;  %2458 = vmatprep.subr.bf16.mxu1 %v3456_v46 }
 0x609   :  { %v1821_v17 = vpop.f32.mrb[20].mxu0  ;;  %v1862_v18 = vpop.f32.mrb[20].mxu1 }
 0x60a   :  { %v1869_v19 = vadd.f32 %v2731_v7, %v1821_v17  ;;  %v1823_v20 = vpop.f32.mrb[21].mxu0  ;;  %v1864_v21 = vpop.f32.mrb[21].mxu1  ;;  %v1871_v31 = vadd.f32 %v2733_v29, %v1862_v18 }
 0x60b   :  { %v1870_v22 = vadd.f32 %v2732_v16, %v1823_v20  ;;  %v1825_v23 = vpop.f32.mrb[22].mxu0  ;;  %v1866_v24 = vpop.f32.mrb[22].mxu1  ;;  %v1872_v28 = vadd.f32 %v2734_v27, %v1864_v21  ;;  %v2811_v21 = vld [vmem:[%s3831_s0 + $0xe0] sm:$0xff] }
 0x60c   :  { %v2767_v25 = vmul.f32 -1.442695, %v1869_v19  ;;  %v1826_v45 = vpop.f32.mrb[23].mxu0  ;;  %v1867_v26 = vpop.f32.mrb[23].mxu1 }
 0x60d   :  { %v2768_v46 = vmul.f32 -1.442695, %v1870_v22  ;;  %v2769_v30 = vmul.f32 -1.442695, %v1872_v28  ;;  %v2812_v22 = vld [vmem:[%s3831_s0 + $0xe8] sm:$0xff] }
 0x60e   :  { %3029 = vpow2.f32 %v2767_v25 }
 0x60f   :  { %3031 = vpow2.f32 %v2768_v46 }
 0x610   :  { %3033 = vpow2.f32 %v2769_v30 }
 0x611   :  { %3035 = vtanh.f32 %v1871_v31 }
 0x618   :  { %v3030_v32 = vpop.eup %3029 }
 0x619   :  { %v3032_v41 = vpop.eup %3031  ;;  %v1876_v42 = vadd.f32 1.0, %v3030_v32 }
 0x61a   :  { %v1882_v43 = vadd.f32 1.0, %v3032_v41  ;;  %v3034_v44 = vpop.eup %3033  ;;  %v2814_v41 = vld [vmem:[%s3831_s0 + $0xf8] sm:$0xff] }
 0x61b   :  { %3037 = vrcp.f32 %v1876_v42  ;;  %v3036_v8 = vpop.eup %3035  ;;  %v1889_v12 = vadd.f32 1.0, %v3034_v44 }
 0x61c   :  { %3039 = vrcp.f32 %v1882_v43  ;;  %v2813_v43 = vld [vmem:[%s3831_s0 + $0xf0] sm:$0xff] }
 0x61d   :  { %3041 = vrcp.f32 %v1889_v12 }
 0x625   :  { %v3038_v9 = vpop.eup %3037 }
 0x626   :  { %v3040_v10 = vpop.eup %3039  ;;  %v1893_v11 = vmul.f32 %v3038_v9, %v3036_v8 }
 0x627   :  { %v1892_v13 = vmul.f32 %v3040_v10, %v3708_v33  ;;  %v3042_v15 = vpop.eup %3041 }
 0x629   :  { %v3761_v14 = vadd.f32 %v1893_v11, %v1892_v13 }
 0x62b   :  { %3043 = vtanh.f32 %v3761_v14 }
 0x635   :  { %v3044_v7 = vpop.eup %3043 }
 0x636   :  { %v1896_v16 = vmul.f32 %v3044_v7, %v3042_v15 }
 0x638   :  { %v1899_v17 = vpack.c.bf16 %v1896_v16, %v1896_v16 }
 0x63a   :  { %2770 = vst [vmem:[%s3832_s2 + $0x14] sm:$0xf] %v1899_v17  ;;  %2135 = vmatmul.mubr.bf16.vlgmr.msra.gmra.mrb[24].mxu0 %v1899_v17  ;;  %2176 = vmatmul.mubr.bf16.vlgmr.msra.gmra.mrb[24].mxu1 %v1899_v17 }
 0x63b   :  { %2418 = vmatpush1.bf16.msra.mxu0 %v3461_v47  ;;  %2459 = vmatpush1.bf16.msra.mxu1 %v3466_v48  ;;  %v2772_v47 = vld [vmem:[%s3831_s0 + $0xc8] sm:$0xff] }
 0x63c   :  { %2419 = vmatprep.subr.bf16.mxu0 %v3475_v0  ;;  %2460 = vmatprep.subr.bf16.mxu1 %v3480_v49 }
 0x63d   :  { %2449 = vmatprep.mubr.bf16.mxu0 %v3077_v1  ;;  %2490 = vmatprep.mubr.bf16.mxu1 %v3077_v1  ;;  %v2771_v1 = vld [vmem:[%s3831_s0 + $0xc0] sm:$0xff] }
 0x63f   :  { %2420 = vmatpush1.bf16.msra.mxu0 %v3485_v6  ;;  %2461 = vmatpush1.bf16.msra.mxu1 %v3490_v50 }
 0x640   :  { %2421 = vmatprep.subr.bf16.mxu0 %v3499_v51  ;;  %2462 = vmatprep.subr.bf16.mxu1 %v3504_v52 }
 0x643   :  { %2422 = vmatpush1.bf16.msra.mxu0 %v3509_v53  ;;  %2463 = vmatpush1.bf16.msra.mxu1 %v3514_v54 }
 0x644   :  { %2423 = vmatprep.subr.bf16.mxu0 %v3523_v55  ;;  %2464 = vmatprep.subr.bf16.mxu1 %v3528_v56 }
 0x647   :  { %2424 = vmatpush1.bf16.msra.mxu0 %v3533_v57  ;;  %2465 = vmatpush1.bf16.msra.mxu1 %v3538_v58  ;;  %v2774_v58 = vld [vmem:[%s3831_s0 + $0xd8] sm:$0xff] }
 0x648   :  { %2425 = vmatprep.subr.bf16.mxu0 %v3552_v60  ;;  %2466 = vmatprep.subr.bf16.mxu1 %v3562_v62  ;;  %v2773_v60 = vld [vmem:[%s3831_s0 + $0xd0] sm:$0xff] }
 0x64b   :  { %2426 = vmatpush1.bf16.msra.mxu0 %v3547_v59  ;;  %2467 = vmatpush1.bf16.msra.mxu1 %v3557_v61 }
 0x64c   :  { %2427 = vmatprep.subr.bf16.mxu0 %v3567_v63  ;;  %2468 = vmatprep.subr.bf16.mxu1 %v3573_v34 }
 0x64f   :  { %2428 = vmatpush1.bf16.msra.mxu0 %v3580_v35  ;;  %2469 = vmatpush1.bf16.msra.mxu1 %v3587_v36 }
 0x650   :  { %2429 = vmatprep.subr.bf16.mxu0 %v3592_v37  ;;  %2470 = vmatprep.subr.bf16.mxu1 %v3598_v38 }
 0x653   :  { %2430 = vmatpush1.bf16.msra.mxu0 %v3604_v39  ;;  %2471 = vmatpush1.bf16.msra.mxu1 %v3611_v40 }
 0x654   :  { %2431 = vmatprep.subr.bf16.mxu0 %v3616_v2  ;;  %2472 = vmatprep.subr.bf16.mxu1 %v3622_v3 }
 0x657   :  { %2432 = vmatpush1.bf16.msra.mxu0 %v3628_v4  ;;  %2473 = vmatpush1.bf16.msra.mxu1 %v3635_v5 }
 0x70d   :  { %v2136_v48 = vpop.f32.mrb[24].mxu0  ;;  %v2177_v0 = vpop.f32.mrb[24].mxu1 }
 0x70e   :  { %v2184_v49 = vadd.f32 %v2771_v1, %v2136_v48  ;;  %v2138_v6 = vpop.f32.mrb[25].mxu0  ;;  %v2179_v50 = vpop.f32.mrb[25].mxu1  ;;  %v2186_v62 = vadd.f32 %v2773_v60, %v2177_v0 }
 0x70f   :  { %v2185_v51 = vadd.f32 %v2772_v47, %v2138_v6  ;;  %v2140_v52 = vpop.f32.mrb[26].mxu0  ;;  %v2181_v53 = vpop.f32.mrb[26].mxu1  ;;  %v2187_v59 = vadd.f32 %v2774_v58, %v2179_v50 }
 0x710   :  { %v2807_v54 = vmul.f32 -1.442695, %v2184_v49  ;;  %v2141_v55 = vpop.f32.mrb[27].mxu0  ;;  %v2182_v56 = vpop.f32.mrb[27].mxu1 }
 0x711   :  { %v2808_v57 = vmul.f32 -1.442695, %v2185_v51  ;;  %v2809_v61 = vmul.f32 -1.442695, %v2187_v59 }
 0x712   :  { %3045 = vpow2.f32 %v2807_v54 }
 0x713   :  { %3047 = vpow2.f32 %v2808_v57 }
 0x714   :  { %3049 = vpow2.f32 %v2809_v61 }
 0x715   :  { %3051 = vtanh.f32 %v2186_v62 }
 0x71c   :  { %v3046_v63 = vpop.eup %3045 }
 0x71d   :  { %v3048_v34 = vpop.eup %3047  ;;  %v2191_v35 = vadd.f32 1.0, %v3046_v63 }
 0x71e   :  { %v2197_v36 = vadd.f32 1.0, %v3048_v34  ;;  %v3050_v37 = vpop.eup %3049 }
 0x71f   :  { %3053 = vrcp.f32 %v2191_v35  ;;  %v3052_v38 = vpop.eup %3051  ;;  %v2204_v3 = vadd.f32 1.0, %v3050_v37 }
 0x720   :  { %3055 = vrcp.f32 %v2197_v36 }
 0x721   :  { %3057 = vrcp.f32 %v2204_v3 }
 0x729   :  { %v3054_v39 = vpop.eup %3053 }
 0x72a   :  { %v3056_v40 = vpop.eup %3055  ;;  %v2208_v2 = vmul.f32 %v3054_v39, %v3052_v38 }
 0x72b   :  { %v2207_v4 = vmul.f32 %v3056_v40, %v3761_v14  ;;  %v3058_v33 = vpop.eup %3057 }
 0x72d   :  { %v2209_v5 = vadd.f32 %v2208_v2, %v2207_v4 }
 0x72f   :  { %3059 = vtanh.f32 %v2209_v5 }
 0x739   :  { %v3060_v18 = vpop.eup %3059 }
 0x73a   :  { %v2211_v19 = vmul.f32 %v3060_v18, %v3058_v33 }
 0x73c   :  { %v2214_v20 = vpack.c.bf16 %v2211_v19, %v2211_v19 }
 0x73e   :  { %2810 = vst [vmem:[%s3832_s2 + $0x18] sm:$0xf] %v2214_v20  ;;  %2450 = vmatmul.mubr.bf16.vlgmr.msra.gmra.mrb[28].mxu0 %v2214_v20  ;;  %2491 = vmatmul.mubr.bf16.vlgmr.msra.gmra.mrb[28].mxu1 %v2214_v20 }
 0x811   :  { %v2451_v23 = vpop.f32.mrb[28].mxu0  ;;  %v2492_v24 = vpop.f32.mrb[28].mxu1 }
 0x812   :  { %v2499_v25 = vadd.f32 %v2811_v21, %v2451_v23  ;;  %v2453_v45 = vpop.f32.mrb[29].mxu0  ;;  %v2494_v26 = vpop.f32.mrb[29].mxu1  ;;  %v2501_v8 = vadd.f32 %v2813_v43, %v2492_v24 }
 0x813   :  { %v2500_v46 = vadd.f32 %v2812_v22, %v2453_v45  ;;  %v2455_v27 = vpop.f32.mrb[30].mxu0  ;;  %v2496_v28 = vpop.f32.mrb[30].mxu1  ;;  %v2502_v42 = vadd.f32 %v2814_v41, %v2494_v26 }
 0x814   :  { %v2847_v29 = vmul.f32 -1.442695, %v2499_v25  ;;  %v2456_v30 = vpop.f32.mrb[31].mxu0  ;;  %v2497_v31 = vpop.f32.mrb[31].mxu1 }
 0x815   :  { %v2848_v32 = vmul.f32 -1.442695, %v2500_v46  ;;  %v2849_v44 = vmul.f32 -1.442695, %v2502_v42 }
 0x816   :  { %3061 = vpow2.f32 %v2847_v29 }
 0x817   :  { %3063 = vpow2.f32 %v2848_v32 }
 0x818   :  { %3065 = vpow2.f32 %v2849_v44 }
 0x819   :  { %3067 = vtanh.f32 %v2501_v8 }
 0x820   :  { %v3062_v9 = vpop.eup %3061 }
 0x821   :  { %v3064_v10 = vpop.eup %3063  ;;  %v2506_v11 = vadd.f32 1.0, %v3062_v9 }
 0x822   :  { %v2512_v12 = vadd.f32 1.0, %v3064_v10  ;;  %v3066_v13 = vpop.eup %3065 }
 0x823   :  { %3069 = vrcp.f32 %v2506_v11  ;;  %v3068_v14 = vpop.eup %3067  ;;  %v2519_v17 = vadd.f32 1.0, %v3066_v13 }
 0x824   :  { %3071 = vrcp.f32 %v2512_v12 }
 0x825   :  { %3073 = vrcp.f32 %v2519_v17 }
 0x82d   :  { %v3070_v15 = vpop.eup %3069 }
 0x82e   :  { %v3072_v7 = vpop.eup %3071  ;;  %v2523_v16 = vmul.f32 %v3070_v15, %v3068_v14 }
 0x82f   :  { %v2522_v1 = vmul.f32 %v3072_v7, %v2209_v5  ;;  %v3074_v48 = vpop.eup %3073 }
 0x831   :  { %v2524_v47 = vadd.f32 %v2523_v16, %v2522_v1 }
 0x833   :  { %3075 = vtanh.f32 %v2524_v47 }
 0x83d   :  { %v3076_v0 = vpop.eup %3075 }
 0x83e   :  { %v2526_v49 = vmul.f32 %v3076_v0, %v3074_v48 }
 0x840   :  { %v2529_v6 = vpack.c.bf16 %v2526_v49, %v2526_v49 }
 0x842   :  { %2850 = vst [vmem:[%s3832_s2 + $0x1c] sm:$0xf] %v2529_v6 }

</bundles_post_ra>
